<compile_context>
chip_gen: v7x
topology: tpu7x:2x2x1
jax: 0.10.0
libtpu: 0.0.40
codegen_flags: <defaults>
</compile_context>

<pallas_src>
import jax
import jax.numpy as jnp
from jax import lax
from jax.experimental import pallas as pl
from jax.experimental.pallas import tpu as pltpu


# ----------------------------------------------------------------------------
# Fused encoder+decoder LSTM kernel. Grid: one step per time-chunk (sequential).
# ----------------------------------------------------------------------------
def _fused_lstm_ae_kernel(
    x_ref,        # (T_blk*B, Din)     time-major input chunk (row = t*B + b)
    wih_e_ref,    # (Din, 4H)          encoder W_ih^T
    b_e_ref,      # (1, 4H)            encoder b_ih + b_hh
    wcomb_ref,    # (H, 4H + 4Din)     [W_hh_enc^T | W_ih_dec^T]  (both consume h_e)
    whh_d_ref,    # (Din, 4Din)        decoder W_hh^T
    b_d_ref,      # (1, 4Din)          decoder b_ih + b_hh
    out_ref,      # (B, T_blk*Din)     decoded chunk, lane-dense
    hpe_ref,      # (B, 4H)   carried  h_e_prev @ W_hh_enc  (encoder recurrent proj)
    ce_ref,       # (B, H)    carried  encoder cell state
    hd_ref,       # (B, Din)  carried  decoder hidden state
    cd_ref,       # (B, Din)  carried  decoder cell state
):
    rows, Din = x_ref.shape
    B, H = ce_ref.shape
    T_blk = rows // B
    G4H = 4 * H
    G4D = 4 * Din

    @pl.when(pl.program_id(0) == 0)
    def _():
        # PyTorch default: zero initial hidden / cell state for both layers.
        hpe_ref[...] = jnp.zeros_like(hpe_ref)   # 0 @ W_hh_enc == 0
        ce_ref[...] = jnp.zeros_like(ce_ref)
        hd_ref[...] = jnp.zeros_like(hd_ref)
        cd_ref[...] = jnp.zeros_like(cd_ref)

    # ---- Chunk-level precompute (off the serial critical path) -------------
    # Encoder input projection for every timestep of the chunk: one MXU push.
    x2d = x_ref[...]                                              # (T_blk*B, Din)
    xproj = jnp.dot(x2d, wih_e_ref[...],
                    preferred_element_type=jnp.float32) + b_e_ref[...]   # (T_blk*B, 4H)

    w_comb = wcomb_ref[...]                                       # (H, 4H+4Din)
    w_hh_d = whh_d_ref[...]                                       # (Din, 4Din)
    # Hoisted bias broadcast (JAX does not CSE broadcast_in_dim inside the unroll).
    b_d = jnp.broadcast_to(b_d_ref[...], (B, G4D))                # (B, 4Din)

    hp_enc = hpe_ref[...]
    c_e = ce_ref[...]
    h_d = hd_ref[...]
    c_d = cd_ref[...]

    def gates_to_hc(gates, c_prev, hid):
        # 2 EUP pushes per cell: full-width sigmoid + full-width tanh, slice after.
        sg = jax.nn.sigmoid(gates)
        tg = jnp.tanh(gates)
        i_g = sg[:, 0 * hid:1 * hid]
        f_g = sg[:, 1 * hid:2 * hid]
        g_g = tg[:, 2 * hid:3 * hid]
        o_g = sg[:, 3 * hid:4 * hid]
        c_new = f_g * c_prev + i_g * g_g
        h_new = o_g * jnp.tanh(c_new)
        return h_new, c_new

    # Output store grouping: pick group so group*Din is a multiple of 128 lanes
    # (unmasked vst, bounded live vregs). Fall back to one store per chunk.
    if Din % 128 == 0:
        group = 1
    elif (128 % Din == 0) and (T_blk % (128 // Din) == 0):
        group = 128 // Din
    else:
        group = T_blk

    # ---- Static unroll over the chunk: recurrence carried in vregs ---------
    outs = []
    for t in range(T_blk):
        xp_t = xproj[t * B:(t + 1) * B, :]                        # (B, 4H) contiguous rows
        # Encoder cell: gates = x_t@Wih + b (precomputed) + h_e_prev@Whh (carried).
        h_e, c_e = gates_to_hc(xp_t + hp_enc, c_e, H)
        # One fused MXU push for both consumers of h_e.
        hp = jnp.dot(h_e, w_comb, preferred_element_type=jnp.float32)   # (B, 4H+4Din)
        hp_enc = hp[:, :G4H]                                      # -> encoder step t+1
        # Decoder cell (no lane concat: separate recurrent push).
        dec_gates = hp[:, G4H:] + jnp.dot(h_d, w_hh_d,
                                          preferred_element_type=jnp.float32) + b_d
        h_d, c_d = gates_to_hc(dec_gates, c_d, Din)
        outs.append(h_d)

        if len(outs) == group:
            gi = (t + 1) // group - 1
            start = gi * group * Din
            blk = outs[0] if group == 1 else jnp.concatenate(outs, axis=-1)
            out_ref[:, start:start + group * Din] = blk.astype(out_ref.dtype)
            outs = []

    # Carry state to the next chunk.
    hpe_ref[...] = hp_enc
    ce_ref[...] = c_e
    hd_ref[...] = h_d
    cd_ref[...] = c_d


def _pick_t_block(seq_len, batch, din, cap=64):
    """Largest divisor t of seq_len (<= cap) that is BlockSpec-legal:
    (t*batch) % 8 == 0 (or t == seq_len) and (t*din) % 128 == 0 (or t == seq_len)."""
    best = None
    for t in range(1, min(seq_len, cap) + 1):
        if seq_len % t:
            continue
        rows_ok = (t * batch) % 8 == 0 or t == seq_len
        lanes_ok = (t * din) % 128 == 0 or t == seq_len
        if rows_ok and lanes_ok:
            best = t
    # Full-sequence block is always legal (block shape == full array dims).
    return best if best is not None else seq_len


def lstm_autoencoder_pallas(x, w_ih_enc, b_enc, w_comb, w_hh_dec, b_dec, *, t_block=None):
    """Fused encoder+decoder LSTM autoencoder forward.

    Args:
      x:        (B, S, Din) float32, batch-first (PyTorch layout).
      w_ih_enc: (Din, 4H)        encoder weight_ih^T.
      b_enc:    (1, 4H)          encoder bias_ih + bias_hh.
      w_comb:   (H, 4H + 4Din)   [encoder weight_hh^T | decoder weight_ih^T].
      w_hh_dec: (Din, 4Din)      decoder weight_hh^T.
      b_dec:    (1, 4Din)        decoder bias_ih + bias_hh.
    Returns:
      (B, S, Din) float32 decoded sequence.
    """
    B, S, Din = x.shape
    H = w_ih_enc.shape[1] // 4
    assert w_ih_enc.shape == (Din, 4 * H), w_ih_enc.shape
    assert b_enc.shape == (1, 4 * H), b_enc.shape
    assert w_comb.shape == (H, 4 * H + 4 * Din), w_comb.shape
    assert w_hh_dec.shape == (Din, 4 * Din), w_hh_dec.shape
    assert b_dec.shape == (1, 4 * Din), b_dec.shape

    if t_block is None:
        t_block = _pick_t_block(S, B, Din)
    assert S % t_block == 0
    n_chunks = S // t_block

    # Time-major 2D layout (row = t*B + b): per-step reads inside the kernel become
    # contiguous sublane slices of the precomputed projection; no in-kernel reshape.
    x_tm = jnp.transpose(x, (1, 0, 2)).reshape(S * B, Din)

    out_flat = pl.pallas_call(
        _fused_lstm_ae_kernel,
        out_shape=jax.ShapeDtypeStruct((B, S * Din), jnp.float32),
        grid_spec=pltpu.PrefetchScalarGridSpec(
            num_scalar_prefetch=0,
            grid=(n_chunks,),
            in_specs=[
                pl.BlockSpec((t_block * B, Din), lambda i: (i, 0)),      # x chunk
                pl.BlockSpec((Din, 4 * H), lambda i: (0, 0)),            # W_ih enc (resident)
                pl.BlockSpec((1, 4 * H), lambda i: (0, 0)),              # b enc
                pl.BlockSpec((H, 4 * H + 4 * Din), lambda i: (0, 0)),    # [Whh_enc|Wih_dec]
                pl.BlockSpec((Din, 4 * Din), lambda i: (0, 0)),          # W_hh dec
                pl.BlockSpec((1, 4 * Din), lambda i: (0, 0)),            # b dec
            ],
            out_specs=pl.BlockSpec((B, t_block * Din), lambda i: (0, i)),
            scratch_shapes=[
                pltpu.VMEM((B, 4 * H), jnp.float32),   # h_e_prev @ W_hh_enc (carried)
                pltpu.VMEM((B, H), jnp.float32),       # encoder c
                pltpu.VMEM((B, Din), jnp.float32),     # decoder h
                pltpu.VMEM((B, Din), jnp.float32),     # decoder c
            ],
        ),
        compiler_params=pltpu.CompilerParams(
            # Recurrence across time-chunks: must run sequentially on one core.
            # (On v7x, a leading "parallel" batch-block axis would engage the 2nd TC
            #  once B is large enough to split into >=8-row blocks.)
            dimension_semantics=("arbitrary",),
        ),
    )(x_tm, w_ih_enc, b_enc, w_comb, w_hh_dec, b_dec)

    # Free reshape (contiguous): (B, S*Din) -> (B, S, Din).
    return out_flat.reshape(B, S, Din)


# ----------------------------------------------------------------------------
# Parameter initialization (deterministic, PyTorch-style uniform(-k, k)).
# ----------------------------------------------------------------------------
def init_lstm_params(key, input_dim, hidden_dim):
    k = 1.0 / jnp.sqrt(jnp.float32(hidden_dim))
    k1, k2, k3, k4 = jax.random.split(key, 4)
    w_ih = jax.random.uniform(k1, (4 * hidden_dim, input_dim), jnp.float32, -k, k)
    w_hh = jax.random.uniform(k2, (4 * hidden_dim, hidden_dim), jnp.float32, -k, k)
    b_ih = jax.random.uniform(k3, (4 * hidden_dim,), jnp.float32, -k, k)
    b_hh = jax.random.uniform(k4, (4 * hidden_dim,), jnp.float32, -k, k)
    return {
        "wih_t": w_ih.T,                                      # (D_in, 4H)
        "whh_t": w_hh.T,                                      # (H, 4H)
        "bias": (b_ih + b_hh).reshape(1, 4 * hidden_dim),     # (1, 4H)
    }


def init_autoencoder_params(key, input_dim, hidden_dim):
    ke, kd = jax.random.split(key)
    return {
        "encoder": init_lstm_params(ke, input_dim, hidden_dim),   # in -> hidden
        "decoder": init_lstm_params(kd, hidden_dim, input_dim),   # hidden -> in
    }


# ----------------------------------------------------------------------------
# Forward pass (matches LSTMAutoencoder.forward). Single fused pallas_call.
# ----------------------------------------------------------------------------
@jax.jit
def lstm_autoencoder_forward(x, params):
    """x: (batch, seq, input_dim), batch_first like PyTorch. Returns same shape."""
    enc, dec = params["encoder"], params["decoder"]
    # Column-fuse the two matmuls that consume h_e: [W_hh_enc^T | W_ih_dec^T].
    w_comb = jnp.concatenate([enc["whh_t"], dec["wih_t"]], axis=1)   # (H, 4H+4Din)
    return lstm_autoencoder_pallas(
        x, enc["wih_t"], enc["bias"], w_comb, dec["whh_t"], dec["bias"])


# ----------------------------------------------------------------------------
# Pure-JAX reference (lax.scan, split-weight nn.LSTM math) for correctness check.
# ----------------------------------------------------------------------------
def _lstm_ref(x_tm, p):
    S, B, _ = x_tm.shape
    H = p["whh_t"].shape[0]

    def step(carry, x_t):
        h, c = carry
        gates = x_t @ p["wih_t"] + h @ p["whh_t"] + p["bias"]
        i = jax.nn.sigmoid(gates[:, 0 * H:1 * H])
        f = jax.nn.sigmoid(gates[:, 1 * H:2 * H])
        g = jnp.tanh(gates[:, 2 * H:3 * H])
        o = jax.nn.sigmoid(gates[:, 3 * H:4 * H])
        c = f * c + i * g
        h = o * jnp.tanh(c)
        return (h, c), h

    init = (jnp.zeros((B, H), jnp.float32), jnp.zeros((B, H), jnp.float32))
    _, hs = lax.scan(step, init, x_tm)
    return hs


def _forward_ref(x, params):
    x_tm = jnp.transpose(x, (1, 0, 2))
    enc = _lstm_ref(x_tm, params["encoder"])
    dec = _lstm_ref(enc, params["decoder"])
    return jnp.transpose(dec, (1, 0, 2))


if __name__ == "__main__":
    batch, seq, input_dim, hidden_dim = 2, 8, 16, 32

    key = jax.random.PRNGKey(0)
    kx, kp = jax.random.split(key)
    x = jax.random.normal(kx, (batch, seq, input_dim), jnp.float32)
    params = init_autoencoder_params(kp, input_dim, hidden_dim)

    out = lstm_autoencoder_forward(x, params)
    out = jax.block_until_ready(out)

    assert out.shape == (batch, seq, input_dim), out.shape

    ref = _forward_ref(x, params)
    err = float(jnp.max(jnp.abs(out - ref)))
    assert jnp.allclose(out, ref, atol=5e-5, rtol=5e-5), err

    print("KERNEL_OK")
</pallas_src>

<mosaic_0001>
module attributes {stable_mosaic.version = 11 : i64} {
  func.func @_fused_lstm_ae_kernel(%arg0: i32, %arg1: memref<16x16xf32, #tpu.memory_space<vmem>>, %arg2: memref<16x128xf32, #tpu.memory_space<vmem>>, %arg3: memref<1x128xf32, #tpu.memory_space<vmem>>, %arg4: memref<32x192xf32, #tpu.memory_space<vmem>>, %arg5: memref<16x64xf32, #tpu.memory_space<vmem>>, %arg6: memref<1x64xf32, #tpu.memory_space<vmem>>, %arg7: memref<2x128xf32, #tpu.memory_space<vmem>>, %arg8: memref<2x128xf32, #tpu.memory_space<vmem>>, %arg9: memref<2x32xf32, #tpu.memory_space<vmem>>, %arg10: memref<2x16xf32, #tpu.memory_space<vmem>>, %arg11: memref<2x16xf32, #tpu.memory_space<vmem>>) attributes {dimension_semantics = [#tpu.dimension_semantics<arbitrary>], iteration_bounds = array<i64: 1>, scalar_prefetch = 0 : i64, scratch_operands = 4 : i64, tpu.core_type = #tpu.core_type<tc>, window_params = [{transform_indices = @transform_0, window_bounds = array<i64: 16, 16>}, {pipeline_mode = #tpu.pipeline_mode<synchronous>, transform_indices = @transform_1, window_bounds = array<i64: 16, 128>}, {pipeline_mode = #tpu.pipeline_mode<synchronous>, transform_indices = @transform_2, window_bounds = array<i64: 1, 128>}, {pipeline_mode = #tpu.pipeline_mode<synchronous>, transform_indices = @transform_3, window_bounds = array<i64: 32, 192>}, {pipeline_mode = #tpu.pipeline_mode<synchronous>, transform_indices = @transform_4, window_bounds = array<i64: 16, 64>}, {pipeline_mode = #tpu.pipeline_mode<synchronous>, transform_indices = @transform_5, window_bounds = array<i64: 1, 64>}, {transform_indices = @transform_6, window_bounds = array<i64: 2, 128>}]} {
    %c0_i32 = arith.constant 0 : i32
    %0 = arith.cmpi eq, %arg0, %c0_i32 : i32
    %1 = arith.extui %0 : i1 to i32
    %c0_i32_0 = arith.constant 0 : i32
    %2 = arith.cmpi ne, %1, %c0_i32_0 : i32
    scf.if %2 {
      %cst_62 = arith.constant 0.000000e+00 : f32
      %328 = vector.broadcast %cst_62 : f32 to vector<2x128xf32>
      %c0_63 = arith.constant 0 : index
      %c0_64 = arith.constant 0 : index
      %329 = vector.load %arg8[%c0_63, %c0_64] : memref<2x128xf32, #tpu.memory_space<vmem>>, vector<2x128xf32>
      tpu.vector_store %arg8[%c0_63, %c0_64], %328 {strides = array<i32>} : memref<2x128xf32, #tpu.memory_space<vmem>>, vector<2x128xf32>,
      %cst_65 = arith.constant 0.000000e+00 : f32
      %330 = vector.broadcast %cst_65 : f32 to vector<2x32xf32>
      %c0_66 = arith.constant 0 : index
      %c0_67 = arith.constant 0 : index
      %331 = vector.load %arg9[%c0_66, %c0_67] : memref<2x32xf32, #tpu.memory_space<vmem>>, vector<2x32xf32>
      tpu.vector_store %arg9[%c0_66, %c0_67], %330 {strides = array<i32>} : memref<2x32xf32, #tpu.memory_space<vmem>>, vector<2x32xf32>,
      %cst_68 = arith.constant 0.000000e+00 : f32
      %332 = vector.broadcast %cst_68 : f32 to vector<2x16xf32>
      %c0_69 = arith.constant 0 : index
      %c0_70 = arith.constant 0 : index
      %333 = vector.load %arg10[%c0_69, %c0_70] : memref<2x16xf32, #tpu.memory_space<vmem>>, vector<2x16xf32>
      tpu.vector_store %arg10[%c0_69, %c0_70], %332 {strides = array<i32>} : memref<2x16xf32, #tpu.memory_space<vmem>>, vector<2x16xf32>,
      %cst_71 = arith.constant 0.000000e+00 : f32
      %334 = vector.broadcast %cst_71 : f32 to vector<2x16xf32>
      %c0_72 = arith.constant 0 : index
      %c0_73 = arith.constant 0 : index
      %335 = vector.load %arg11[%c0_72, %c0_73] : memref<2x16xf32, #tpu.memory_space<vmem>>, vector<2x16xf32>
      tpu.vector_store %arg11[%c0_72, %c0_73], %334 {strides = array<i32>} : memref<2x16xf32, #tpu.memory_space<vmem>>, vector<2x16xf32>,
    } else {
    }
    %c0 = arith.constant 0 : index
    %c0_1 = arith.constant 0 : index
    %3 = vector.load %arg1[%c0, %c0_1] : memref<16x16xf32, #tpu.memory_space<vmem>>, vector<16x16xf32>
    %c0_2 = arith.constant 0 : index
    %c0_3 = arith.constant 0 : index
    %4 = vector.load %arg2[%c0_2, %c0_3] : memref<16x128xf32, #tpu.memory_space<vmem>>, vector<16x128xf32>
    %cst = arith.constant dense<0.000000e+00> : vector<16x128xf32>
    %5 = tpu.matmul %3, %4, %cst {dimension_numbers = #tpu.dot_dimension_numbers<[1], [0], [0], [1], [0, 0, 1, 1], [], []>} : vector<16x16xf32>, vector<16x128xf32>, vector<16x128xf32> -> vector<16x128xf32>
    %c0_4 = arith.constant 0 : index
    %c0_5 = arith.constant 0 : index
    %6 = vector.load %arg3[%c0_4, %c0_5] : memref<1x128xf32, #tpu.memory_space<vmem>>, vector<1x128xf32>
    %7 = vector.broadcast %6 : vector<1x128xf32> to vector<16x128xf32>
    %8 = arith.addf %5, %7 : vector<16x128xf32>
    %c0_6 = arith.constant 0 : index
    %c0_7 = arith.constant 0 : index
    %9 = vector.load %arg4[%c0_6, %c0_7] : memref<32x192xf32, #tpu.memory_space<vmem>>, vector<32x192xf32>
    %c0_8 = arith.constant 0 : index
    %c0_9 = arith.constant 0 : index
    %10 = vector.load %arg5[%c0_8, %c0_9] : memref<16x64xf32, #tpu.memory_space<vmem>>, vector<16x64xf32>
    %c0_10 = arith.constant 0 : index
    %c0_11 = arith.constant 0 : index
    %11 = vector.load %arg6[%c0_10, %c0_11] : memref<1x64xf32, #tpu.memory_space<vmem>>, vector<1x64xf32>
    %12 = vector.shape_cast %11 : vector<1x64xf32> to vector<1x64xf32>
    %13 = vector.broadcast %12 : vector<1x64xf32> to vector<2x64xf32>
    %c0_12 = arith.constant 0 : index
    %c0_13 = arith.constant 0 : index
    %14 = vector.load %arg8[%c0_12, %c0_13] : memref<2x128xf32, #tpu.memory_space<vmem>>, vector<2x128xf32>
    %c0_14 = arith.constant 0 : index
    %c0_15 = arith.constant 0 : index
    %15 = vector.load %arg9[%c0_14, %c0_15] : memref<2x32xf32, #tpu.memory_space<vmem>>, vector<2x32xf32>
    %c0_16 = arith.constant 0 : index
    %c0_17 = arith.constant 0 : index
    %16 = vector.load %arg10[%c0_16, %c0_17] : memref<2x16xf32, #tpu.memory_space<vmem>>, vector<2x16xf32>
    %c0_18 = arith.constant 0 : index
    %c0_19 = arith.constant 0 : index
    %17 = vector.load %arg11[%c0_18, %c0_19] : memref<2x16xf32, #tpu.memory_space<vmem>>, vector<2x16xf32>
    %18 = vector.extract_strided_slice %8 {offsets = [0, 0], sizes = [2, 128], strides = [1, 1]} : vector<16x128xf32> to vector<2x128xf32>
    %19 = arith.addf %18, %14 : vector<2x128xf32>
    %20 = arith.negf %19 : vector<2x128xf32>
    %21 = math.exp %20 : vector<2x128xf32>
    %cst_20 = arith.constant 1.000000e+00 : f32
    %22 = vector.broadcast %cst_20 : f32 to vector<2x128xf32>
    %23 = arith.addf %22, %21 : vector<2x128xf32>
    %24 = arith.divf %22, %23 : vector<2x128xf32>
    %25 = math.tanh %19 : vector<2x128xf32>
    %26 = vector.extract_strided_slice %24 {offsets = [0, 0], sizes = [2, 32], strides = [1, 1]} : vector<2x128xf32> to vector<2x32xf32>
    %27 = vector.extract_strided_slice %24 {offsets = [0, 32], sizes = [2, 32], strides = [1, 1]} : vector<2x128xf32> to vector<2x32xf32>
    %28 = vector.extract_strided_slice %25 {offsets = [0, 64], sizes = [2, 32], strides = [1, 1]} : vector<2x128xf32> to vector<2x32xf32>
    %29 = vector.extract_strided_slice %24 {offsets = [0, 96], sizes = [2, 32], strides = [1, 1]} : vector<2x128xf32> to vector<2x32xf32>
    %30 = arith.mulf %27, %15 : vector<2x32xf32>
    %31 = arith.mulf %26, %28 : vector<2x32xf32>
    %32 = arith.addf %30, %31 : vector<2x32xf32>
    %33 = math.tanh %32 : vector<2x32xf32>
    %34 = arith.mulf %29, %33 : vector<2x32xf32>
    %cst_21 = arith.constant dense<0.000000e+00> : vector<2x192xf32>
    %35 = tpu.matmul %34, %9, %cst_21 {dimension_numbers = #tpu.dot_dimension_numbers<[1], [0], [0], [1], [0, 0, 1, 1], [], []>} : vector<2x32xf32>, vector<32x192xf32>, vector<2x192xf32> -> vector<2x192xf32>
    %36 = vector.extract_strided_slice %35 {offsets = [0, 0], sizes = [2, 128], strides = [1, 1]} : vector<2x192xf32> to vector<2x128xf32>
    %37 = vector.extract_strided_slice %35 {offsets = [0, 128], sizes = [2, 64], strides = [1, 1]} : vector<2x192xf32> to vector<2x64xf32>
    %cst_22 = arith.constant dense<0.000000e+00> : vector<2x64xf32>
    %38 = tpu.matmul %16, %10, %cst_22 {dimension_numbers = #tpu.dot_dimension_numbers<[1], [0], [0], [1], [0, 0, 1, 1], [], []>} : vector<2x16xf32>, vector<16x64xf32>, vector<2x64xf32> -> vector<2x64xf32>
    %39 = arith.addf %37, %38 : vector<2x64xf32>
    %40 = arith.addf %39, %13 : vector<2x64xf32>
    %41 = arith.negf %40 : vector<2x64xf32>
    %42 = math.exp %41 : vector<2x64xf32>
    %cst_23 = arith.constant 1.000000e+00 : f32
    %43 = vector.broadcast %cst_23 : f32 to vector<2x64xf32>
    %44 = arith.addf %43, %42 : vector<2x64xf32>
    %45 = arith.divf %43, %44 : vector<2x64xf32>
    %46 = math.tanh %40 : vector<2x64xf32>
    %47 = vector.extract_strided_slice %45 {offsets = [0, 0], sizes = [2, 16], strides = [1, 1]} : vector<2x64xf32> to vector<2x16xf32>
    %48 = vector.extract_strided_slice %45 {offsets = [0, 16], sizes = [2, 16], strides = [1, 1]} : vector<2x64xf32> to vector<2x16xf32>
    %49 = vector.extract_strided_slice %46 {offsets = [0, 32], sizes = [2, 16], strides = [1, 1]} : vector<2x64xf32> to vector<2x16xf32>
    %50 = vector.extract_strided_slice %45 {offsets = [0, 48], sizes = [2, 16], strides = [1, 1]} : vector<2x64xf32> to vector<2x16xf32>
    %51 = arith.mulf %48, %17 : vector<2x16xf32>
    %52 = arith.mulf %47, %49 : vector<2x16xf32>
    %53 = arith.addf %51, %52 : vector<2x16xf32>
    %54 = math.tanh %53 : vector<2x16xf32>
    %55 = arith.mulf %50, %54 : vector<2x16xf32>
    %56 = vector.extract_strided_slice %8 {offsets = [2, 0], sizes = [2, 128], strides = [1, 1]} : vector<16x128xf32> to vector<2x128xf32>
    %57 = arith.addf %56, %36 : vector<2x128xf32>
    %58 = arith.negf %57 : vector<2x128xf32>
    %59 = math.exp %58 : vector<2x128xf32>
    %cst_24 = arith.constant 1.000000e+00 : f32
    %60 = vector.broadcast %cst_24 : f32 to vector<2x128xf32>
    %61 = arith.addf %60, %59 : vector<2x128xf32>
    %62 = arith.divf %60, %61 : vector<2x128xf32>
    %63 = math.tanh %57 : vector<2x128xf32>
    %64 = vector.extract_strided_slice %62 {offsets = [0, 0], sizes = [2, 32], strides = [1, 1]} : vector<2x128xf32> to vector<2x32xf32>
    %65 = vector.extract_strided_slice %62 {offsets = [0, 32], sizes = [2, 32], strides = [1, 1]} : vector<2x128xf32> to vector<2x32xf32>
    %66 = vector.extract_strided_slice %63 {offsets = [0, 64], sizes = [2, 32], strides = [1, 1]} : vector<2x128xf32> to vector<2x32xf32>
    %67 = vector.extract_strided_slice %62 {offsets = [0, 96], sizes = [2, 32], strides = [1, 1]} : vector<2x128xf32> to vector<2x32xf32>
    %68 = arith.mulf %65, %32 : vector<2x32xf32>
    %69 = arith.mulf %64, %66 : vector<2x32xf32>
    %70 = arith.addf %68, %69 : vector<2x32xf32>
    %71 = math.tanh %70 : vector<2x32xf32>
    %72 = arith.mulf %67, %71 : vector<2x32xf32>
    %cst_25 = arith.constant dense<0.000000e+00> : vector<2x192xf32>
    %73 = tpu.matmul %72, %9, %cst_25 {dimension_numbers = #tpu.dot_dimension_numbers<[1], [0], [0], [1], [0, 0, 1, 1], [], []>} : vector<2x32xf32>, vector<32x192xf32>, vector<2x192xf32> -> vector<2x192xf32>
    %74 = vector.extract_strided_slice %73 {offsets = [0, 0], sizes = [2, 128], strides = [1, 1]} : vector<2x192xf32> to vector<2x128xf32>
    %75 = vector.extract_strided_slice %73 {offsets = [0, 128], sizes = [2, 64], strides = [1, 1]} : vector<2x192xf32> to vector<2x64xf32>
    %cst_26 = arith.constant dense<0.000000e+00> : vector<2x64xf32>
    %76 = tpu.matmul %55, %10, %cst_26 {dimension_numbers = #tpu.dot_dimension_numbers<[1], [0], [0], [1], [0, 0, 1, 1], [], []>} : vector<2x16xf32>, vector<16x64xf32>, vector<2x64xf32> -> vector<2x64xf32>
    %77 = arith.addf %75, %76 : vector<2x64xf32>
    %78 = arith.addf %77, %13 : vector<2x64xf32>
    %79 = arith.negf %78 : vector<2x64xf32>
    %80 = math.exp %79 : vector<2x64xf32>
    %cst_27 = arith.constant 1.000000e+00 : f32
    %81 = vector.broadcast %cst_27 : f32 to vector<2x64xf32>
    %82 = arith.addf %81, %80 : vector<2x64xf32>
    %83 = arith.divf %81, %82 : vector<2x64xf32>
    %84 = math.tanh %78 : vector<2x64xf32>
    %85 = vector.extract_strided_slice %83 {offsets = [0, 0], sizes = [2, 16], strides = [1, 1]} : vector<2x64xf32> to vector<2x16xf32>
    %86 = vector.extract_strided_slice %83 {offsets = [0, 16], sizes = [2, 16], strides = [1, 1]} : vector<2x64xf32> to vector<2x16xf32>
    %87 = vector.extract_strided_slice %84 {offsets = [0, 32], sizes = [2, 16], strides = [1, 1]} : vector<2x64xf32> to vector<2x16xf32>
    %88 = vector.extract_strided_slice %83 {offsets = [0, 48], sizes = [2, 16], strides = [1, 1]} : vector<2x64xf32> to vector<2x16xf32>
    %89 = arith.mulf %86, %53 : vector<2x16xf32>
    %90 = arith.mulf %85, %87 : vector<2x16xf32>
    %91 = arith.addf %89, %90 : vector<2x16xf32>
    %92 = math.tanh %91 : vector<2x16xf32>
    %93 = arith.mulf %88, %92 : vector<2x16xf32>
    %94 = vector.extract_strided_slice %8 {offsets = [4, 0], sizes = [2, 128], strides = [1, 1]} : vector<16x128xf32> to vector<2x128xf32>
    %95 = arith.addf %94, %74 : vector<2x128xf32>
    %96 = arith.negf %95 : vector<2x128xf32>
    %97 = math.exp %96 : vector<2x128xf32>
    %cst_28 = arith.constant 1.000000e+00 : f32
    %98 = vector.broadcast %cst_28 : f32 to vector<2x128xf32>
    %99 = arith.addf %98, %97 : vector<2x128xf32>
    %100 = arith.divf %98, %99 : vector<2x128xf32>
    %101 = math.tanh %95 : vector<2x128xf32>
    %102 = vector.extract_strided_slice %100 {offsets = [0, 0], sizes = [2, 32], strides = [1, 1]} : vector<2x128xf32> to vector<2x32xf32>
    %103 = vector.extract_strided_slice %100 {offsets = [0, 32], sizes = [2, 32], strides = [1, 1]} : vector<2x128xf32> to vector<2x32xf32>
    %104 = vector.extract_strided_slice %101 {offsets = [0, 64], sizes = [2, 32], strides = [1, 1]} : vector<2x128xf32> to vector<2x32xf32>
    %105 = vector.extract_strided_slice %100 {offsets = [0, 96], sizes = [2, 32], strides = [1, 1]} : vector<2x128xf32> to vector<2x32xf32>
    %106 = arith.mulf %103, %70 : vector<2x32xf32>
    %107 = arith.mulf %102, %104 : vector<2x32xf32>
    %108 = arith.addf %106, %107 : vector<2x32xf32>
    %109 = math.tanh %108 : vector<2x32xf32>
    %110 = arith.mulf %105, %109 : vector<2x32xf32>
    %cst_29 = arith.constant dense<0.000000e+00> : vector<2x192xf32>
    %111 = tpu.matmul %110, %9, %cst_29 {dimension_numbers = #tpu.dot_dimension_numbers<[1], [0], [0], [1], [0, 0, 1, 1], [], []>} : vector<2x32xf32>, vector<32x192xf32>, vector<2x192xf32> -> vector<2x192xf32>
    %112 = vector.extract_strided_slice %111 {offsets = [0, 0], sizes = [2, 128], strides = [1, 1]} : vector<2x192xf32> to vector<2x128xf32>
    %113 = vector.extract_strided_slice %111 {offsets = [0, 128], sizes = [2, 64], strides = [1, 1]} : vector<2x192xf32> to vector<2x64xf32>
    %cst_30 = arith.constant dense<0.000000e+00> : vector<2x64xf32>
    %114 = tpu.matmul %93, %10, %cst_30 {dimension_numbers = #tpu.dot_dimension_numbers<[1], [0], [0], [1], [0, 0, 1, 1], [], []>} : vector<2x16xf32>, vector<16x64xf32>, vector<2x64xf32> -> vector<2x64xf32>
    %115 = arith.addf %113, %114 : vector<2x64xf32>
    %116 = arith.addf %115, %13 : vector<2x64xf32>
    %117 = arith.negf %116 : vector<2x64xf32>
    %118 = math.exp %117 : vector<2x64xf32>
    %cst_31 = arith.constant 1.000000e+00 : f32
    %119 = vector.broadcast %cst_31 : f32 to vector<2x64xf32>
    %120 = arith.addf %119, %118 : vector<2x64xf32>
    %121 = arith.divf %119, %120 : vector<2x64xf32>
    %122 = math.tanh %116 : vector<2x64xf32>
    %123 = vector.extract_strided_slice %121 {offsets = [0, 0], sizes = [2, 16], strides = [1, 1]} : vector<2x64xf32> to vector<2x16xf32>
    %124 = vector.extract_strided_slice %121 {offsets = [0, 16], sizes = [2, 16], strides = [1, 1]} : vector<2x64xf32> to vector<2x16xf32>
    %125 = vector.extract_strided_slice %122 {offsets = [0, 32], sizes = [2, 16], strides = [1, 1]} : vector<2x64xf32> to vector<2x16xf32>
    %126 = vector.extract_strided_slice %121 {offsets = [0, 48], sizes = [2, 16], strides = [1, 1]} : vector<2x64xf32> to vector<2x16xf32>
    %127 = arith.mulf %124, %91 : vector<2x16xf32>
    %128 = arith.mulf %123, %125 : vector<2x16xf32>
    %129 = arith.addf %127, %128 : vector<2x16xf32>
    %130 = math.tanh %129 : vector<2x16xf32>
    %131 = arith.mulf %126, %130 : vector<2x16xf32>
    %132 = vector.extract_strided_slice %8 {offsets = [6, 0], sizes = [2, 128], strides = [1, 1]} : vector<16x128xf32> to vector<2x128xf32>
    %133 = arith.addf %132, %112 : vector<2x128xf32>
    %134 = arith.negf %133 : vector<2x128xf32>
    %135 = math.exp %134 : vector<2x128xf32>
    %cst_32 = arith.constant 1.000000e+00 : f32
    %136 = vector.broadcast %cst_32 : f32 to vector<2x128xf32>
    %137 = arith.addf %136, %135 : vector<2x128xf32>
    %138 = arith.divf %136, %137 : vector<2x128xf32>
    %139 = math.tanh %133 : vector<2x128xf32>
    %140 = vector.extract_strided_slice %138 {offsets = [0, 0], sizes = [2, 32], strides = [1, 1]} : vector<2x128xf32> to vector<2x32xf32>
    %141 = vector.extract_strided_slice %138 {offsets = [0, 32], sizes = [2, 32], strides = [1, 1]} : vector<2x128xf32> to vector<2x32xf32>
    %142 = vector.extract_strided_slice %139 {offsets = [0, 64], sizes = [2, 32], strides = [1, 1]} : vector<2x128xf32> to vector<2x32xf32>
    %143 = vector.extract_strided_slice %138 {offsets = [0, 96], sizes = [2, 32], strides = [1, 1]} : vector<2x128xf32> to vector<2x32xf32>
    %144 = arith.mulf %141, %108 : vector<2x32xf32>
    %145 = arith.mulf %140, %142 : vector<2x32xf32>
    %146 = arith.addf %144, %145 : vector<2x32xf32>
    %147 = math.tanh %146 : vector<2x32xf32>
    %148 = arith.mulf %143, %147 : vector<2x32xf32>
    %cst_33 = arith.constant dense<0.000000e+00> : vector<2x192xf32>
    %149 = tpu.matmul %148, %9, %cst_33 {dimension_numbers = #tpu.dot_dimension_numbers<[1], [0], [0], [1], [0, 0, 1, 1], [], []>} : vector<2x32xf32>, vector<32x192xf32>, vector<2x192xf32> -> vector<2x192xf32>
    %150 = vector.extract_strided_slice %149 {offsets = [0, 0], sizes = [2, 128], strides = [1, 1]} : vector<2x192xf32> to vector<2x128xf32>
    %151 = vector.extract_strided_slice %149 {offsets = [0, 128], sizes = [2, 64], strides = [1, 1]} : vector<2x192xf32> to vector<2x64xf32>
    %cst_34 = arith.constant dense<0.000000e+00> : vector<2x64xf32>
    %152 = tpu.matmul %131, %10, %cst_34 {dimension_numbers = #tpu.dot_dimension_numbers<[1], [0], [0], [1], [0, 0, 1, 1], [], []>} : vector<2x16xf32>, vector<16x64xf32>, vector<2x64xf32> -> vector<2x64xf32>
    %153 = arith.addf %151, %152 : vector<2x64xf32>
    %154 = arith.addf %153, %13 : vector<2x64xf32>
    %155 = arith.negf %154 : vector<2x64xf32>
    %156 = math.exp %155 : vector<2x64xf32>
    %cst_35 = arith.constant 1.000000e+00 : f32
    %157 = vector.broadcast %cst_35 : f32 to vector<2x64xf32>
    %158 = arith.addf %157, %156 : vector<2x64xf32>
    %159 = arith.divf %157, %158 : vector<2x64xf32>
    %160 = math.tanh %154 : vector<2x64xf32>
    %161 = vector.extract_strided_slice %159 {offsets = [0, 0], sizes = [2, 16], strides = [1, 1]} : vector<2x64xf32> to vector<2x16xf32>
    %162 = vector.extract_strided_slice %159 {offsets = [0, 16], sizes = [2, 16], strides = [1, 1]} : vector<2x64xf32> to vector<2x16xf32>
    %163 = vector.extract_strided_slice %160 {offsets = [0, 32], sizes = [2, 16], strides = [1, 1]} : vector<2x64xf32> to vector<2x16xf32>
    %164 = vector.extract_strided_slice %159 {offsets = [0, 48], sizes = [2, 16], strides = [1, 1]} : vector<2x64xf32> to vector<2x16xf32>
    %165 = arith.mulf %162, %129 : vector<2x16xf32>
    %166 = arith.mulf %161, %163 : vector<2x16xf32>
    %167 = arith.addf %165, %166 : vector<2x16xf32>
    %168 = math.tanh %167 : vector<2x16xf32>
    %169 = arith.mulf %164, %168 : vector<2x16xf32>
    %170 = vector.extract_strided_slice %8 {offsets = [8, 0], sizes = [2, 128], strides = [1, 1]} : vector<16x128xf32> to vector<2x128xf32>
    %171 = arith.addf %170, %150 : vector<2x128xf32>
    %172 = arith.negf %171 : vector<2x128xf32>
    %173 = math.exp %172 : vector<2x128xf32>
    %cst_36 = arith.constant 1.000000e+00 : f32
    %174 = vector.broadcast %cst_36 : f32 to vector<2x128xf32>
    %175 = arith.addf %174, %173 : vector<2x128xf32>
    %176 = arith.divf %174, %175 : vector<2x128xf32>
    %177 = math.tanh %171 : vector<2x128xf32>
    %178 = vector.extract_strided_slice %176 {offsets = [0, 0], sizes = [2, 32], strides = [1, 1]} : vector<2x128xf32> to vector<2x32xf32>
    %179 = vector.extract_strided_slice %176 {offsets = [0, 32], sizes = [2, 32], strides = [1, 1]} : vector<2x128xf32> to vector<2x32xf32>
    %180 = vector.extract_strided_slice %177 {offsets = [0, 64], sizes = [2, 32], strides = [1, 1]} : vector<2x128xf32> to vector<2x32xf32>
    %181 = vector.extract_strided_slice %176 {offsets = [0, 96], sizes = [2, 32], strides = [1, 1]} : vector<2x128xf32> to vector<2x32xf32>
    %182 = arith.mulf %179, %146 : vector<2x32xf32>
    %183 = arith.mulf %178, %180 : vector<2x32xf32>
    %184 = arith.addf %182, %183 : vector<2x32xf32>
    %185 = math.tanh %184 : vector<2x32xf32>
    %186 = arith.mulf %181, %185 : vector<2x32xf32>
    %cst_37 = arith.constant dense<0.000000e+00> : vector<2x192xf32>
    %187 = tpu.matmul %186, %9, %cst_37 {dimension_numbers = #tpu.dot_dimension_numbers<[1], [0], [0], [1], [0, 0, 1, 1], [], []>} : vector<2x32xf32>, vector<32x192xf32>, vector<2x192xf32> -> vector<2x192xf32>
    %188 = vector.extract_strided_slice %187 {offsets = [0, 0], sizes = [2, 128], strides = [1, 1]} : vector<2x192xf32> to vector<2x128xf32>
    %189 = vector.extract_strided_slice %187 {offsets = [0, 128], sizes = [2, 64], strides = [1, 1]} : vector<2x192xf32> to vector<2x64xf32>
    %cst_38 = arith.constant dense<0.000000e+00> : vector<2x64xf32>
    %190 = tpu.matmul %169, %10, %cst_38 {dimension_numbers = #tpu.dot_dimension_numbers<[1], [0], [0], [1], [0, 0, 1, 1], [], []>} : vector<2x16xf32>, vector<16x64xf32>, vector<2x64xf32> -> vector<2x64xf32>
    %191 = arith.addf %189, %190 : vector<2x64xf32>
    %192 = arith.addf %191, %13 : vector<2x64xf32>
    %193 = arith.negf %192 : vector<2x64xf32>
    %194 = math.exp %193 : vector<2x64xf32>
    %cst_39 = arith.constant 1.000000e+00 : f32
    %195 = vector.broadcast %cst_39 : f32 to vector<2x64xf32>
    %196 = arith.addf %195, %194 : vector<2x64xf32>
    %197 = arith.divf %195, %196 : vector<2x64xf32>
    %198 = math.tanh %192 : vector<2x64xf32>
    %199 = vector.extract_strided_slice %197 {offsets = [0, 0], sizes = [2, 16], strides = [1, 1]} : vector<2x64xf32> to vector<2x16xf32>
    %200 = vector.extract_strided_slice %197 {offsets = [0, 16], sizes = [2, 16], strides = [1, 1]} : vector<2x64xf32> to vector<2x16xf32>
    %201 = vector.extract_strided_slice %198 {offsets = [0, 32], sizes = [2, 16], strides = [1, 1]} : vector<2x64xf32> to vector<2x16xf32>
    %202 = vector.extract_strided_slice %197 {offsets = [0, 48], sizes = [2, 16], strides = [1, 1]} : vector<2x64xf32> to vector<2x16xf32>
    %203 = arith.mulf %200, %167 : vector<2x16xf32>
    %204 = arith.mulf %199, %201 : vector<2x16xf32>
    %205 = arith.addf %203, %204 : vector<2x16xf32>
    %206 = math.tanh %205 : vector<2x16xf32>
    %207 = arith.mulf %202, %206 : vector<2x16xf32>
    %208 = vector.extract_strided_slice %8 {offsets = [10, 0], sizes = [2, 128], strides = [1, 1]} : vector<16x128xf32> to vector<2x128xf32>
    %209 = arith.addf %208, %188 : vector<2x128xf32>
    %210 = arith.negf %209 : vector<2x128xf32>
    %211 = math.exp %210 : vector<2x128xf32>
    %cst_40 = arith.constant 1.000000e+00 : f32
    %212 = vector.broadcast %cst_40 : f32 to vector<2x128xf32>
    %213 = arith.addf %212, %211 : vector<2x128xf32>
    %214 = arith.divf %212, %213 : vector<2x128xf32>
    %215 = math.tanh %209 : vector<2x128xf32>
    %216 = vector.extract_strided_slice %214 {offsets = [0, 0], sizes = [2, 32], strides = [1, 1]} : vector<2x128xf32> to vector<2x32xf32>
    %217 = vector.extract_strided_slice %214 {offsets = [0, 32], sizes = [2, 32], strides = [1, 1]} : vector<2x128xf32> to vector<2x32xf32>
    %218 = vector.extract_strided_slice %215 {offsets = [0, 64], sizes = [2, 32], strides = [1, 1]} : vector<2x128xf32> to vector<2x32xf32>
    %219 = vector.extract_strided_slice %214 {offsets = [0, 96], sizes = [2, 32], strides = [1, 1]} : vector<2x128xf32> to vector<2x32xf32>
    %220 = arith.mulf %217, %184 : vector<2x32xf32>
    %221 = arith.mulf %216, %218 : vector<2x32xf32>
    %222 = arith.addf %220, %221 : vector<2x32xf32>
    %223 = math.tanh %222 : vector<2x32xf32>
    %224 = arith.mulf %219, %223 : vector<2x32xf32>
    %cst_41 = arith.constant dense<0.000000e+00> : vector<2x192xf32>
    %225 = tpu.matmul %224, %9, %cst_41 {dimension_numbers = #tpu.dot_dimension_numbers<[1], [0], [0], [1], [0, 0, 1, 1], [], []>} : vector<2x32xf32>, vector<32x192xf32>, vector<2x192xf32> -> vector<2x192xf32>
    %226 = vector.extract_strided_slice %225 {offsets = [0, 0], sizes = [2, 128], strides = [1, 1]} : vector<2x192xf32> to vector<2x128xf32>
    %227 = vector.extract_strided_slice %225 {offsets = [0, 128], sizes = [2, 64], strides = [1, 1]} : vector<2x192xf32> to vector<2x64xf32>
    %cst_42 = arith.constant dense<0.000000e+00> : vector<2x64xf32>
    %228 = tpu.matmul %207, %10, %cst_42 {dimension_numbers = #tpu.dot_dimension_numbers<[1], [0], [0], [1], [0, 0, 1, 1], [], []>} : vector<2x16xf32>, vector<16x64xf32>, vector<2x64xf32> -> vector<2x64xf32>
    %229 = arith.addf %227, %228 : vector<2x64xf32>
    %230 = arith.addf %229, %13 : vector<2x64xf32>
    %231 = arith.negf %230 : vector<2x64xf32>
    %232 = math.exp %231 : vector<2x64xf32>
    %cst_43 = arith.constant 1.000000e+00 : f32
    %233 = vector.broadcast %cst_43 : f32 to vector<2x64xf32>
    %234 = arith.addf %233, %232 : vector<2x64xf32>
    %235 = arith.divf %233, %234 : vector<2x64xf32>
    %236 = math.tanh %230 : vector<2x64xf32>
    %237 = vector.extract_strided_slice %235 {offsets = [0, 0], sizes = [2, 16], strides = [1, 1]} : vector<2x64xf32> to vector<2x16xf32>
    %238 = vector.extract_strided_slice %235 {offsets = [0, 16], sizes = [2, 16], strides = [1, 1]} : vector<2x64xf32> to vector<2x16xf32>
    %239 = vector.extract_strided_slice %236 {offsets = [0, 32], sizes = [2, 16], strides = [1, 1]} : vector<2x64xf32> to vector<2x16xf32>
    %240 = vector.extract_strided_slice %235 {offsets = [0, 48], sizes = [2, 16], strides = [1, 1]} : vector<2x64xf32> to vector<2x16xf32>
    %241 = arith.mulf %238, %205 : vector<2x16xf32>
    %242 = arith.mulf %237, %239 : vector<2x16xf32>
    %243 = arith.addf %241, %242 : vector<2x16xf32>
    %244 = math.tanh %243 : vector<2x16xf32>
    %245 = arith.mulf %240, %244 : vector<2x16xf32>
    %246 = vector.extract_strided_slice %8 {offsets = [12, 0], sizes = [2, 128], strides = [1, 1]} : vector<16x128xf32> to vector<2x128xf32>
    %247 = arith.addf %246, %226 : vector<2x128xf32>
    %248 = arith.negf %247 : vector<2x128xf32>
    %249 = math.exp %248 : vector<2x128xf32>
    %cst_44 = arith.constant 1.000000e+00 : f32
    %250 = vector.broadcast %cst_44 : f32 to vector<2x128xf32>
    %251 = arith.addf %250, %249 : vector<2x128xf32>
    %252 = arith.divf %250, %251 : vector<2x128xf32>
    %253 = math.tanh %247 : vector<2x128xf32>
    %254 = vector.extract_strided_slice %252 {offsets = [0, 0], sizes = [2, 32], strides = [1, 1]} : vector<2x128xf32> to vector<2x32xf32>
    %255 = vector.extract_strided_slice %252 {offsets = [0, 32], sizes = [2, 32], strides = [1, 1]} : vector<2x128xf32> to vector<2x32xf32>
    %256 = vector.extract_strided_slice %253 {offsets = [0, 64], sizes = [2, 32], strides = [1, 1]} : vector<2x128xf32> to vector<2x32xf32>
    %257 = vector.extract_strided_slice %252 {offsets = [0, 96], sizes = [2, 32], strides = [1, 1]} : vector<2x128xf32> to vector<2x32xf32>
    %258 = arith.mulf %255, %222 : vector<2x32xf32>
    %259 = arith.mulf %254, %256 : vector<2x32xf32>
    %260 = arith.addf %258, %259 : vector<2x32xf32>
    %261 = math.tanh %260 : vector<2x32xf32>
    %262 = arith.mulf %257, %261 : vector<2x32xf32>
    %cst_45 = arith.constant dense<0.000000e+00> : vector<2x192xf32>
    %263 = tpu.matmul %262, %9, %cst_45 {dimension_numbers = #tpu.dot_dimension_numbers<[1], [0], [0], [1], [0, 0, 1, 1], [], []>} : vector<2x32xf32>, vector<32x192xf32>, vector<2x192xf32> -> vector<2x192xf32>
    %264 = vector.extract_strided_slice %263 {offsets = [0, 0], sizes = [2, 128], strides = [1, 1]} : vector<2x192xf32> to vector<2x128xf32>
    %265 = vector.extract_strided_slice %263 {offsets = [0, 128], sizes = [2, 64], strides = [1, 1]} : vector<2x192xf32> to vector<2x64xf32>
    %cst_46 = arith.constant dense<0.000000e+00> : vector<2x64xf32>
    %266 = tpu.matmul %245, %10, %cst_46 {dimension_numbers = #tpu.dot_dimension_numbers<[1], [0], [0], [1], [0, 0, 1, 1], [], []>} : vector<2x16xf32>, vector<16x64xf32>, vector<2x64xf32> -> vector<2x64xf32>
    %267 = arith.addf %265, %266 : vector<2x64xf32>
    %268 = arith.addf %267, %13 : vector<2x64xf32>
    %269 = arith.negf %268 : vector<2x64xf32>
    %270 = math.exp %269 : vector<2x64xf32>
    %cst_47 = arith.constant 1.000000e+00 : f32
    %271 = vector.broadcast %cst_47 : f32 to vector<2x64xf32>
    %272 = arith.addf %271, %270 : vector<2x64xf32>
    %273 = arith.divf %271, %272 : vector<2x64xf32>
    %274 = math.tanh %268 : vector<2x64xf32>
    %275 = vector.extract_strided_slice %273 {offsets = [0, 0], sizes = [2, 16], strides = [1, 1]} : vector<2x64xf32> to vector<2x16xf32>
    %276 = vector.extract_strided_slice %273 {offsets = [0, 16], sizes = [2, 16], strides = [1, 1]} : vector<2x64xf32> to vector<2x16xf32>
    %277 = vector.extract_strided_slice %274 {offsets = [0, 32], sizes = [2, 16], strides = [1, 1]} : vector<2x64xf32> to vector<2x16xf32>
    %278 = vector.extract_strided_slice %273 {offsets = [0, 48], sizes = [2, 16], strides = [1, 1]} : vector<2x64xf32> to vector<2x16xf32>
    %279 = arith.mulf %276, %243 : vector<2x16xf32>
    %280 = arith.mulf %275, %277 : vector<2x16xf32>
    %281 = arith.addf %279, %280 : vector<2x16xf32>
    %282 = math.tanh %281 : vector<2x16xf32>
    %283 = arith.mulf %278, %282 : vector<2x16xf32>
    %284 = vector.extract_strided_slice %8 {offsets = [14, 0], sizes = [2, 128], strides = [1, 1]} : vector<16x128xf32> to vector<2x128xf32>
    %285 = arith.addf %284, %264 : vector<2x128xf32>
    %286 = arith.negf %285 : vector<2x128xf32>
    %287 = math.exp %286 : vector<2x128xf32>
    %cst_48 = arith.constant 1.000000e+00 : f32
    %288 = vector.broadcast %cst_48 : f32 to vector<2x128xf32>
    %289 = arith.addf %288, %287 : vector<2x128xf32>
    %290 = arith.divf %288, %289 : vector<2x128xf32>
    %291 = math.tanh %285 : vector<2x128xf32>
    %292 = vector.extract_strided_slice %290 {offsets = [0, 0], sizes = [2, 32], strides = [1, 1]} : vector<2x128xf32> to vector<2x32xf32>
    %293 = vector.extract_strided_slice %290 {offsets = [0, 32], sizes = [2, 32], strides = [1, 1]} : vector<2x128xf32> to vector<2x32xf32>
    %294 = vector.extract_strided_slice %291 {offsets = [0, 64], sizes = [2, 32], strides = [1, 1]} : vector<2x128xf32> to vector<2x32xf32>
    %295 = vector.extract_strided_slice %290 {offsets = [0, 96], sizes = [2, 32], strides = [1, 1]} : vector<2x128xf32> to vector<2x32xf32>
    %296 = arith.mulf %293, %260 : vector<2x32xf32>
    %297 = arith.mulf %292, %294 : vector<2x32xf32>
    %298 = arith.addf %296, %297 : vector<2x32xf32>
    %299 = math.tanh %298 : vector<2x32xf32>
    %300 = arith.mulf %295, %299 : vector<2x32xf32>
    %cst_49 = arith.constant dense<0.000000e+00> : vector<2x192xf32>
    %301 = tpu.matmul %300, %9, %cst_49 {dimension_numbers = #tpu.dot_dimension_numbers<[1], [0], [0], [1], [0, 0, 1, 1], [], []>} : vector<2x32xf32>, vector<32x192xf32>, vector<2x192xf32> -> vector<2x192xf32>
    %302 = vector.extract_strided_slice %301 {offsets = [0, 0], sizes = [2, 128], strides = [1, 1]} : vector<2x192xf32> to vector<2x128xf32>
    %303 = vector.extract_strided_slice %301 {offsets = [0, 128], sizes = [2, 64], strides = [1, 1]} : vector<2x192xf32> to vector<2x64xf32>
    %cst_50 = arith.constant dense<0.000000e+00> : vector<2x64xf32>
    %304 = tpu.matmul %283, %10, %cst_50 {dimension_numbers = #tpu.dot_dimension_numbers<[1], [0], [0], [1], [0, 0, 1, 1], [], []>} : vector<2x16xf32>, vector<16x64xf32>, vector<2x64xf32> -> vector<2x64xf32>
    %305 = arith.addf %303, %304 : vector<2x64xf32>
    %306 = arith.addf %305, %13 : vector<2x64xf32>
    %307 = arith.negf %306 : vector<2x64xf32>
    %308 = math.exp %307 : vector<2x64xf32>
    %cst_51 = arith.constant 1.000000e+00 : f32
    %309 = vector.broadcast %cst_51 : f32 to vector<2x64xf32>
    %310 = arith.addf %309, %308 : vector<2x64xf32>
    %311 = arith.divf %309, %310 : vector<2x64xf32>
    %312 = math.tanh %306 : vector<2x64xf32>
    %313 = vector.extract_strided_slice %311 {offsets = [0, 0], sizes = [2, 16], strides = [1, 1]} : vector<2x64xf32> to vector<2x16xf32>
    %314 = vector.extract_strided_slice %311 {offsets = [0, 16], sizes = [2, 16], strides = [1, 1]} : vector<2x64xf32> to vector<2x16xf32>
    %315 = vector.extract_strided_slice %312 {offsets = [0, 32], sizes = [2, 16], strides = [1, 1]} : vector<2x64xf32> to vector<2x16xf32>
    %316 = vector.extract_strided_slice %311 {offsets = [0, 48], sizes = [2, 16], strides = [1, 1]} : vector<2x64xf32> to vector<2x16xf32>
    %317 = arith.mulf %314, %281 : vector<2x16xf32>
    %318 = arith.mulf %313, %315 : vector<2x16xf32>
    %319 = arith.addf %317, %318 : vector<2x16xf32>
    %320 = math.tanh %319 : vector<2x16xf32>
    %321 = arith.mulf %316, %320 : vector<2x16xf32>
    %322 = tpu.concatenate %55, %93, %131, %169, %207, %245, %283, %321 in 1 : vector<2x16xf32>, vector<2x16xf32>, vector<2x16xf32>, vector<2x16xf32>, vector<2x16xf32>, vector<2x16xf32>, vector<2x16xf32>, vector<2x16xf32> -> vector<2x128xf32>
    %c0_52 = arith.constant 0 : index
    %c0_53 = arith.constant 0 : index
    %323 = vector.load %arg7[%c0_52, %c0_53] : memref<2x128xf32, #tpu.memory_space<vmem>>, vector<2x128xf32>
    tpu.vector_store %arg7[%c0_52, %c0_53], %322 {strides = array<i32>} : memref<2x128xf32, #tpu.memory_space<vmem>>, vector<2x128xf32>,
    %c0_54 = arith.constant 0 : index
    %c0_55 = arith.constant 0 : index
    %324 = vector.load %arg8[%c0_54, %c0_55] : memref<2x128xf32, #tpu.memory_space<vmem>>, vector<2x128xf32>
    tpu.vector_store %arg8[%c0_54, %c0_55], %302 {strides = array<i32>} : memref<2x128xf32, #tpu.memory_space<vmem>>, vector<2x128xf32>,
    %c0_56 = arith.constant 0 : index
    %c0_57 = arith.constant 0 : index
    %325 = vector.load %arg9[%c0_56, %c0_57] : memref<2x32xf32, #tpu.memory_space<vmem>>, vector<2x32xf32>
    tpu.vector_store %arg9[%c0_56, %c0_57], %298 {strides = array<i32>} : memref<2x32xf32, #tpu.memory_space<vmem>>, vector<2x32xf32>,
    %c0_58 = arith.constant 0 : index
    %c0_59 = arith.constant 0 : index
    %326 = vector.load %arg10[%c0_58, %c0_59] : memref<2x16xf32, #tpu.memory_space<vmem>>, vector<2x16xf32>
    tpu.vector_store %arg10[%c0_58, %c0_59], %321 {strides = array<i32>} : memref<2x16xf32, #tpu.memory_space<vmem>>, vector<2x16xf32>,
    %c0_60 = arith.constant 0 : index
    %c0_61 = arith.constant 0 : index
    %327 = vector.load %arg11[%c0_60, %c0_61] : memref<2x16xf32, #tpu.memory_space<vmem>>, vector<2x16xf32>
    tpu.vector_store %arg11[%c0_60, %c0_61], %319 {strides = array<i32>} : memref<2x16xf32, #tpu.memory_space<vmem>>, vector<2x16xf32>,
    return
  }
  func.func @transform_0(%arg0: i32) -> (i32, i32) {
    %c0_i32 = arith.constant 0 : i32
    %c0_i32_0 = arith.constant 0 : i32
    return %arg0, %c0_i32 : i32, i32
  }
  func.func @transform_1(%arg0: i32) -> (i32, i32) {
    %c0_i32 = arith.constant 0 : i32
    %c0_i32_0 = arith.constant 0 : i32
    %c0_i32_1 = arith.constant 0 : i32
    return %c0_i32, %c0_i32_0 : i32, i32
  }
  func.func @transform_2(%arg0: i32) -> (i32, i32) {
    %c0_i32 = arith.constant 0 : i32
    %c0_i32_0 = arith.constant 0 : i32
    %c0_i32_1 = arith.constant 0 : i32
    return %c0_i32, %c0_i32_0 : i32, i32
  }
  func.func @transform_3(%arg0: i32) -> (i32, i32) {
    %c0_i32 = arith.constant 0 : i32
    %c0_i32_0 = arith.constant 0 : i32
    %c0_i32_1 = arith.constant 0 : i32
    return %c0_i32, %c0_i32_0 : i32, i32
  }
  func.func @transform_4(%arg0: i32) -> (i32, i32) {
    %c0_i32 = arith.constant 0 : i32
    %c0_i32_0 = arith.constant 0 : i32
    %c0_i32_1 = arith.constant 0 : i32
    return %c0_i32, %c0_i32_0 : i32, i32
  }
  func.func @transform_5(%arg0: i32) -> (i32, i32) {
    %c0_i32 = arith.constant 0 : i32
    %c0_i32_0 = arith.constant 0 : i32
    %c0_i32_1 = arith.constant 0 : i32
    return %c0_i32, %c0_i32_0 : i32, i32
  }
  func.func @transform_6(%arg0: i32) -> (i32, i32) {
    %c0_i32 = arith.constant 0 : i32
    %c0_i32_0 = arith.constant 0 : i32
    return %c0_i32, %arg0 : i32, i32
  }
}

</mosaic_0001>

<bundles_post_ra>
// kernel: lstm_autoencoder_forward.1
= control target key start
LH: loop header
LB: loop body
LE: loop exit
PB: predicated region body
PF: predicated region fallthrough
CT: control target
= control target key end

     0   :  { %vm44_vm0 = vcmask 130048   ;;  %v2226_v5 = vmov 0.0   ;;  %vm28_vm1 = vcmask 254976   ;;  %s2228_s30 = smov 32   ;;  %v2229_v28 = vmov 0.0|0.0   ;;  %s2231_s26 = smov 96   ;;  %s2565_s1 = inlined_call_operand.vmem [shape: f32[16,128], index: 1, kind: input, shape index: {}]   ;;  %s2566_s0 = inlined_call_operand.vmem [shape: f32[16,16], index: 0, kind: input, shape index: {}]   ;;  %s2567_s2 = inlined_call_operand.vmem [shape: f32[1,128], index: 2, kind: input, shape index: {}]   ;;  %s2568_s3 = inlined_call_operand.vmem [shape: f32[32,192], index: 3, kind: input, shape index: {}]   ;;  %s2569_s4 = inlined_call_operand.vmem [shape: f32[16,64], index: 4, kind: input, shape index: {}]   ;;  %s2570_s5 = inlined_call_operand.vmem [shape: f32[1,64], index: 5, kind: input, shape index: {}]   ;;  %s2571_s6 = inlined_call_operand.vmem [shape: f32[2,128], index: 6, kind: output, shape index: {}]  }
   0x1   :  { %v35_v0 = vld [vmem:[%s2565_s1] sm:$0xff]  ;;  %v36_v1 = vld [vmem:[%s2565_s1 + $0x8] sm:$0xff]  ;;  %27 = vst [vmem:[#allocation2] sm:$0x3] %v2226_v5  ;;  %246 = vmatprep.mubr.f32.mxu1 %v2226_v5  ;;  %29 = vst.msk [vmem:[#allocation3] sm:$0x3] %vm28_vm1, %v2226_v5 }
   0x2   :  { %v33_v2 = vld [vmem:[%s2566_s0] sm:$0xff]  ;;  %v1996_v3 = vpack.c.bf16 %v36_v1, %v35_v0  ;;  %v34_v4 = vld [vmem:[%s2566_s0 + $0x8] sm:$0xff]  ;;  %s2227_s0 = smov 64   ;;  %v129_v26 = vld [vmem:[%s2568_s3 + $0x18] sm:$0xff]  ;;  %vm30_vm2 = vcmask 123904   ;;  %vm2230_vm3 = vmmov 0  }
   0x3   :  { %1937 = vmatprep.mubr.msk.f32.mxu0 %vm44_vm0, %v33_v2  ;;  %v1869_v6 = vld [vmem:[%s2567_s2] ss:$0 sm:$0xff]  ;;  %v127_v25 = vld [vmem:[%s2568_s3 + $0x8] sm:$0xff]  ;;  %v128_v30 = vld [vmem:[%s2568_s3 + $0x10] sm:$0xff]  ;;  %31 = vst.msk [vmem:[#allocation4] sm:$0x3] %vm30_vm2, %v2226_v5 }
   0x4   :  { %1997 = vmatprep.subr.bf16.mxu0 %v1996_v3  ;;  %v126_v27 = vld [vmem:[%s2568_s3] sm:$0xff]  ;;  %v2312_v29 = vpack.c.bf16 %v129_v26, %v127_v25  ;;  %v131_v31 = vld [vmem:[%s2568_s3 + $0x28] sm:$0xff]  ;;  %v133_v32 = vld [vmem:[%s2568_s3 + $0x38] sm:$0xff]  ;;  %32 = vst.msk [vmem:[#allocation5] sm:$0x3] %vm30_vm2, %v2226_v5  ;;  %vm179_vm4 = vcmask 261120  }
   0x5   :  { %1999 = vmatpush3.bf16.msra.mxu0 %v1996_v3  ;;  %v2323_v33 = vpack.c.bf16 %v128_v30, %v126_v27  ;;  %v2325_v34 = vpack.c.bf16 %v133_v32, %v131_v31  ;;  %v130_v35 = vld [vmem:[%s2568_s3 + $0x20] sm:$0xff]  ;;  %v132_v36 = vld [vmem:[%s2568_s3 + $0x30] sm:$0xff]  ;;  %v135_v38 = vld [vmem:[%s2569_s4 + $0x8] sm:$0xff]  ;;  %s2232_s27 = smov 16   ;;  %s2234_s28 = smov 48   ;;  %vm1853_vm5 = vcmask 261126  }
   0x6   :  { %2008 = vmatprep.subr.bf16.mxu0 %v2229_v28  ;;  %v134_v37 = vld [vmem:[%s2569_s4] sm:$0xff]  ;;  %2001 = vmatprep.subr.bf16.mxu1 %v2312_v29  ;;  %v2341_v39 = vpack.c.bf16 %v132_v36, %v130_v35  ;;  %s2235_s1 = smov 112   ;;  %vm1837_vm6 = vcmask 392192   ;;  %vm1839_vm7 = vcmask 523264   ;;  %vm1841_vm8 = vcmask 654336  }
   0x7   :  { %2003 = vmatpush1.bf16.msra.mxu1 %v2323_v33  ;;  %v2343_v40 = vpack.c.bf16 %v135_v38, %v134_v37  ;;  %v2372_v51 = vld [vmem:[%s2570_s5] ss:$0 sm:$0xff]  ;;  %s2233_s5 = smov 80   ;;  %vm1843_vm9 = vcmask 785408   ;;  %vm1845_vm10 = vcmask 916480  }
   0x8   :  { %1938 = vmatmul.mubr.msk.f32.vlgmr.msra.gmra.mrb[0].mxu0 %vm44_vm0, %v34_v4  ;;  %v143_v10 = vld [vmem:[#allocation2] sm:$0x3]  ;;  %v144_v14 = vld [vmem:[#allocation3] sm:$0x3]  ;;  %2005 = vmatprep.subr.bf16.mxu1 %v2325_v34 }
   0x9   :  { %2010 = vmatpush3.bf16.msra.mxu0 %v2343_v40  ;;  %1944 = vmatprep.mubr.msk.f32.mxu0 %vm2230_vm3, %v2226_v5 }
   0xa   :  { %2012 = vmatprep.subr.bf16.mxu0 %v2312_v29  ;;  %v145_v42 = vld [vmem:[#allocation4] sm:$0x3] }
   0xb   :  { %2007 = vmatpush1.bf16.msra.mxu1 %v2341_v39  ;;  %v146_v57 = vld [vmem:[#allocation5] sm:$0x3] }
   0xc   :  { %2019 = vmatprep.subr.bf16.mxu1 %v2229_v28  ;;  %1945 = vmatmul.mubr.msk.f32.vlgmr.msra.gmra.mrb[2].mxu0 %vm44_vm0, %v145_v42 }
   0xd   :  { %2014 = vmatpush1.bf16.msra.mxu0 %v2323_v33  ;;  %457 = vmatprep.mubr.f32.mxu0 %v2226_v5 }
   0xe   :  { %2016 = vmatprep.subr.bf16.mxu0 %v2325_v34 }
  0x11   :  { %2018 = vmatpush1.bf16.msra.mxu0 %v2341_v39 }
  0x12   :  { %2030 = vmatprep.subr.bf16.mxu0 %v2229_v28 }
  0xdb   :  { %v1939_v7 = vpop.f32.mrb[0].mxu0 }
  0xdc   :  { %v2291_v8 = vadd.f32 %v1939_v7, %v1869_v6  ;;  %v117_v9 = vpop.f32.mrb[1].mxu0 }
  0xdd   :  { %v2293_v11 = vadd.f32 %v1869_v6, %v117_v9 }
  0xdf   :  { %v147_v12 = vadd.f32 %v143_v10, %v2293_v11  ;;  %v322_v46 = vpop.f32.mrb[2].mxu0 }
  0xe0   :  { %v1946_v47 = vpop.f32.mrb[3].mxu0 }
  0xe1   :  { %2098 = vtanh.f32 %v147_v12  ;;  %v1873_v15 = vmul.f32 -1.442695, %v147_v12 }
  0xe3   :  { %2100 = vpow2.f32 %v1873_v15 }
  0xeb   :  { %v2099_v13 = vpop.eup %2098 }
  0xec   :  { %161 = vrot.lane.b32.xlu0 %v2099_v13, %s2227_s0 }
  0xed   :  { %v2101_v16 = vpop.eup %2100 }
  0xee   :  { %v151_v17 = vadd.f32 1.0, %v2101_v16 }
  0xf0   :  { %156 = vrot.lane.b32.xlu0 %v144_v14, %s2228_s30  ;;  %2102 = vrcp.f32 %v151_v17 }
  0xfa   :  { %v2103_v18 = vpop.eup %2102 }
 0x15e   :  { %v162_v19 = vpop.permute.xlu0 %161 }
 0x15f   :  { %v164_v20 = vmul.f32 %v2103_v18, %v162_v19 }
 0x161   :  { %166 = vrot.lane.b32.xlu1 %v164_v20, %s2228_s30 }
 0x162   :  { %v157_v21 = vpop.permute.xlu0 %156 }
 0x163   :  { %v159_v22 = vmul.f32 %v2103_v18, %v157_v21 }
 0x1d3   :  { %v167_v23 = vpop.permute.xlu1 %166 }
 0x1d4   :  { %v2299_v24 = vadd.f32 %v167_v23, %v159_v22 }
 0x1d6   :  { %2104 = vtanh.f32 %v2299_v24  ;;  %v368_v7 = vrot.slane %v2299_v24, 6 }
 0x1e0   :  { %v2105_v41 = vpop.eup %2104 }
 0x1e1   :  { %172 = vrot.lane.b32.xlu1 %v2105_v41, %s2227_s0 }
 0x253   :  { %v173_v43 = vpop.permute.xlu1 %172 }
 0x254   :  { %v175_v44 = vmul.f32 %v2103_v18, %v173_v43 }
 0x256   :  { %177 = vrot.lane.b32.xlu0 %v175_v44, %s2228_s30 }
 0x2c8   :  { %v178_v45 = vpop.permute.xlu0 %177 }
 0x2c9   :  { %1874 = vmatmul.mubr.msk.f32.vlgmr.msra.gmra.mrb[0].mxu1 %vm179_vm4, %v178_v45 }
 0x2ca   :  { %2021 = vmatpush3.bf16.msra.mxu1 %v2343_v40  ;;  %1951 = vmatprep.mubr.msk.f32.mxu1 %vm2230_vm3, %v2226_v5 }
 0x2cb   :  { %2023 = vmatprep.subr.bf16.mxu1 %v2312_v29 }
 0x39c   :  { %v248_v48 = vpop.f32.mrb[0].mxu1 }
 0x39d   :  { %v357_v49 = vrot.slane %v248_v48, 6  ;;  %v250_v50 = vpop.f32.mrb[1].mxu1 }
 0x39e   :  { %v326_v52 = vadd.f32 %v322_v46, %v250_v50 }
 0x39f   :  { %v359_v53 = vadd.f32 %v357_v49, %v2293_v11 }
 0x3a0   :  { %v327_v54 = vadd.f32 %v2372_v51, %v326_v52 }
 0x3a1   :  { %2106 = vtanh.f32 %v359_v53  ;;  %v1877_v58 = vmul.f32 -1.442695, %v359_v53 }
 0x3a2   :  { %2108 = vtanh.f32 %v327_v54  ;;  %v1876_v59 = vmul.f32 -1.442695, %v327_v54 }
 0x3a3   :  { %2110 = vpow2.f32 %v1877_v58 }
 0x3a4   :  { %2112 = vpow2.f32 %v1876_v59 }
 0x3ab   :  { %v2107_v55 = vpop.eup %2106 }
 0x3ac   :  { %v2109_v56 = vpop.eup %2108  ;;  %372 = vrot.lane.b32.xlu1 %v2107_v55, %s2227_s0 }
 0x3ad   :  { %341 = vrot.lane.b32.xlu0 %v2109_v56, %s2231_s26  ;;  %v2111_v60 = vpop.eup %2110 }
 0x3ae   :  { %v363_v61 = vadd.f32 1.0, %v2111_v60  ;;  %v2113_v62 = vpop.eup %2112 }
 0x3af   :  { %v331_v63 = vadd.f32 1.0, %v2113_v62 }
 0x3b0   :  { %2114 = vrcp.f32 %v363_v61 }
 0x3b1   :  { %336 = vrot.lane.b32.xlu0 %v146_v57, %s2232_s27  ;;  %2116 = vrcp.f32 %v331_v63 }
 0x3ba   :  { %v2115_v0 = vpop.eup %2114 }
 0x3bb   :  { %v2117_v4 = vpop.eup %2116  ;;  %v370_v9 = vmul.f32 %v2115_v0, %v368_v7 }
 0x41e   :  { %v373_v1 = vpop.permute.xlu1 %372 }
 0x41f   :  { %v375_v2 = vmul.f32 %v2115_v0, %v373_v1  ;;  %v342_v3 = vpop.permute.xlu0 %341 }
 0x420   :  { %v344_v6 = vmul.f32 %v2117_v4, %v342_v3 }
 0x421   :  { %377 = vrot.lane.b32.xlu1 %v375_v2, %s2228_s30 }
 0x423   :  { %v337_v10 = vpop.permute.xlu0 %336 }
 0x424   :  { %v339_v14 = vmul.f32 %v2117_v4, %v337_v10 }
 0x425   :  { %346 = vrot.lane.b32.xlu1 %v344_v6, %s2232_s27 }
 0x493   :  { %v378_v12 = vpop.permute.xlu1 %377 }
 0x494   :  { %v2382_v13 = vadd.f32 %v378_v12, %v370_v9 }
 0x496   :  { %2118 = vtanh.f32 %v2382_v13  ;;  %v577_v55 = vrot.slane %v2382_v13, 6 }
 0x497   :  { %v347_v15 = vpop.permute.xlu1 %346 }
 0x498   :  { %v349_v16 = vadd.f32 %v347_v15, %v339_v14 }
 0x49a   :  { %2120 = vtanh.f32 %v349_v16 }
 0x4a0   :  { %v2119_v17 = vpop.eup %2118 }
 0x4a1   :  { %383 = vrot.lane.b32.xlu0 %v2119_v17, %s2227_s0 }
 0x4a4   :  { %v2121_v18 = vpop.eup %2120 }
 0x4a5   :  { %352 = vrot.lane.b32.xlu1 %v2121_v18, %s2228_s30 }
 0x513   :  { %v384_v19 = vpop.permute.xlu0 %383 }
 0x514   :  { %v386_v20 = vmul.f32 %v2115_v0, %v384_v19 }
 0x516   :  { %v388_v21 = vrot.slane %v386_v20, 2 }
 0x517   :  { %v353_v22 = vpop.permute.xlu1 %352 }
 0x518   :  { %v355_v23 = vmul.f32 %v2117_v4, %v353_v22  ;;  %389 = vrot.lane.b32.xlu0 %v388_v21, %s2228_s30 }
 0x51a   :  { %465 = vrot.lane.b32.xlu1 %v355_v23, %s2233_s5 }
 0x58a   :  { %v390_v24 = vpop.permute.xlu0 %389 }
 0x58b   :  { %1878 = vmatmul.mubr.msk.f32.vlgmr.msra.gmra.mrb[4].mxu0 %vm179_vm4, %v390_v24 }
 0x58c   :  { %v2390_v25 = vpop.permute.xlu1 %465  ;;  %2032 = vmatpush3.bf16.msra.mxu0 %v2343_v40  ;;  %1958 = vmatprep.mubr.msk.f32.mxu0 %vm2230_vm3, %v2226_v5 }
 0x58d   :  { %1952 = vmatmul.mubr.msk.f32.vlgmr.msra.gmra.mrb[2].mxu1 %vm44_vm0, %v2390_v25  ;;  %2034 = vmatprep.subr.bf16.mxu0 %v2312_v29 }
 0x58e   :  { %2025 = vmatpush1.bf16.msra.mxu1 %v2323_v33  ;;  %666 = vmatprep.mubr.f32.mxu1 %v2226_v5 }
 0x58f   :  { %2027 = vmatprep.subr.bf16.mxu1 %v2325_v34 }
 0x592   :  { %2029 = vmatpush1.bf16.msra.mxu1 %v2341_v39 }
 0x593   :  { %2041 = vmatprep.subr.bf16.mxu1 %v2229_v28 }
 0x65e   :  { %v459_v26 = vpop.f32.mrb[4].mxu0 }
 0x65f   :  { %v566_v27 = vrot.slane %v459_v26, 4  ;;  %v461_v30 = vpop.f32.mrb[5].mxu0 }
 0x660   :  { %v535_v31 = vpop.f32.mrb[2].mxu1 }
 0x661   :  { %v568_v32 = vadd.f32 %v566_v27, %v2293_v11  ;;  %v539_v35 = vadd.f32 %v535_v31, %v461_v30  ;;  %v1953_v36 = vpop.f32.mrb[3].mxu1 }
 0x663   :  { %2122 = vtanh.f32 %v568_v32  ;;  %v540_v37 = vadd.f32 %v2372_v51, %v539_v35  ;;  %v1881_v42 = vmul.f32 -1.442695, %v568_v32 }
 0x665   :  { %2124 = vtanh.f32 %v540_v37  ;;  %v1880_v43 = vmul.f32 -1.442695, %v540_v37 }
 0x666   :  { %2126 = vpow2.f32 %v1881_v42 }
 0x667   :  { %2128 = vpow2.f32 %v1880_v43 }
 0x66d   :  { %v2123_v38 = vpop.eup %2122 }
 0x66e   :  { %581 = vrot.lane.b32.xlu0 %v2123_v38, %s2227_s0 }
 0x66f   :  { %v2125_v41 = vpop.eup %2124 }
 0x670   :  { %550 = vrot.lane.b32.xlu1 %v2125_v41, %s2231_s26  ;;  %v2127_v44 = vpop.eup %2126 }
 0x671   :  { %v2129_v45 = vpop.eup %2128  ;;  %v572_v46 = vadd.f32 1.0, %v2127_v44 }
 0x672   :  { %v544_v47 = vadd.f32 1.0, %v2129_v45 }
 0x673   :  { %2130 = vrcp.f32 %v572_v46 }
 0x674   :  { %2132 = vrcp.f32 %v544_v47 }
 0x67d   :  { %v2131_v48 = vpop.eup %2130 }
 0x67e   :  { %v2133_v52 = vpop.eup %2132  ;;  %v579_v56 = vmul.f32 %v2131_v48, %v577_v55 }
 0x67f   :  { %v548_v59 = vmul.f32 %v2133_v52, %v349_v16 }
 0x6e0   :  { %v582_v49 = vpop.permute.xlu0 %581 }
 0x6e1   :  { %v584_v50 = vmul.f32 %v2131_v48, %v582_v49 }
 0x6e2   :  { %v551_v53 = vpop.permute.xlu1 %550 }
 0x6e3   :  { %586 = vrot.lane.b32.xlu0 %v584_v50, %s2228_s30  ;;  %v553_v54 = vmul.f32 %v2133_v52, %v551_v53 }
 0x6e5   :  { %555 = vrot.lane.b32.xlu1 %v553_v54, %s2232_s27 }
 0x755   :  { %v587_v57 = vpop.permute.xlu0 %586 }
 0x756   :  { %v2410_v58 = vadd.f32 %v587_v57, %v579_v56 }
 0x757   :  { %v556_v60 = vpop.permute.xlu1 %555 }
 0x758   :  { %2134 = vtanh.f32 %v2410_v58  ;;  %v558_v61 = vadd.f32 %v556_v60, %v548_v59  ;;  %v786_v36 = vrot.slane %v2410_v58, 6 }
 0x75a   :  { %2136 = vtanh.f32 %v558_v61 }
 0x762   :  { %v2135_v62 = vpop.eup %2134 }
 0x763   :  { %592 = vrot.lane.b32.xlu0 %v2135_v62, %s2227_s0 }
 0x764   :  { %v2137_v63 = vpop.eup %2136 }
 0x765   :  { %561 = vrot.lane.b32.xlu1 %v2137_v63, %s2228_s30 }
 0x7d5   :  { %v593_v0 = vpop.permute.xlu0 %592 }
 0x7d6   :  { %v595_v1 = vmul.f32 %v2131_v48, %v593_v0 }
 0x7d7   :  { %v562_v3 = vpop.permute.xlu1 %561 }
 0x7d8   :  { %v597_v2 = vrot.slane %v595_v1, 4  ;;  %v2415_v4 = vmul.f32 %v2133_v52, %v562_v3 }
 0x7da   :  { %598 = vrot.lane.b32.xlu0 %v597_v2, %s2228_s30  ;;  %674 = vrot.lane.b32.xlu1 %v2415_v4, %s2233_s5 }
 0x84c   :  { %v599_v6 = vpop.permute.xlu0 %598  ;;  %v675_v7 = vpop.permute.xlu1 %674 }
 0x84d   :  { %1882 = vmatmul.mubr.msk.f32.vlgmr.msra.gmra.mrb[4].mxu1 %vm179_vm4, %v599_v6  ;;  %1959 = vmatmul.mubr.msk.f32.vlgmr.msra.gmra.mrb[6].mxu0 %vm44_vm0, %v675_v7 }
 0x84e   :  { %2043 = vmatpush3.bf16.msra.mxu1 %v2343_v40  ;;  %2036 = vmatpush1.bf16.msra.mxu0 %v2323_v33 }
 0x84f   :  { %1965 = vmatprep.mubr.msk.f32.mxu1 %vm2230_vm3, %v2226_v5  ;;  %2038 = vmatprep.subr.bf16.mxu0 %v2325_v34 }
 0x850   :  { %875 = vmatprep.mubr.f32.mxu0 %v2226_v5  ;;  %2045 = vmatprep.subr.bf16.mxu1 %v2312_v29 }
 0x852   :  { %2040 = vmatpush1.bf16.msra.mxu0 %v2341_v39 }
 0x853   :  { %2052 = vmatprep.subr.bf16.mxu0 %v2229_v28 }
 0x920   :  { %v668_v9 = vpop.f32.mrb[4].mxu1  ;;  %v744_v12 = vpop.f32.mrb[6].mxu0 }
 0x921   :  { %v775_v10 = vrot.slane %v668_v9, 2  ;;  %v670_v13 = vpop.f32.mrb[5].mxu1  ;;  %v1960_v15 = vpop.f32.mrb[7].mxu0 }
 0x922   :  { %v748_v14 = vadd.f32 %v744_v12, %v670_v13 }
 0x923   :  { %v777_v16 = vadd.f32 %v775_v10, %v2293_v11 }
 0x924   :  { %v749_v17 = vadd.f32 %v2372_v51, %v748_v14 }
 0x925   :  { %2138 = vtanh.f32 %v777_v16  ;;  %v1885_v20 = vmul.f32 -1.442695, %v777_v16 }
 0x926   :  { %2140 = vtanh.f32 %v749_v17  ;;  %v1884_v21 = vmul.f32 -1.442695, %v749_v17 }
 0x927   :  { %2142 = vpow2.f32 %v1885_v20 }
 0x928   :  { %2144 = vpow2.f32 %v1884_v21 }
 0x92f   :  { %v2139_v18 = vpop.eup %2138 }
 0x930   :  { %v2141_v19 = vpop.eup %2140  ;;  %790 = vrot.lane.b32.xlu0 %v2139_v18, %s2227_s0 }
 0x931   :  { %759 = vrot.lane.b32.xlu1 %v2141_v19, %s2231_s26  ;;  %v2143_v22 = vpop.eup %2142 }
 0x932   :  { %v2145_v23 = vpop.eup %2144  ;;  %v781_v24 = vadd.f32 1.0, %v2143_v22 }
 0x933   :  { %v753_v26 = vadd.f32 1.0, %v2145_v23 }
 0x934   :  { %2146 = vrcp.f32 %v781_v24 }
 0x935   :  { %2148 = vrcp.f32 %v753_v26 }
 0x93e   :  { %v2147_v11 = vpop.eup %2146 }
 0x93f   :  { %v2149_v30 = vpop.eup %2148  ;;  %v788_v37 = vmul.f32 %v2147_v11, %v786_v36 }
 0x940   :  { %v757_v41 = vmul.f32 %v2149_v30, %v558_v61 }
 0x9a2   :  { %v791_v27 = vpop.permute.xlu0 %790 }
 0x9a3   :  { %v793_v31 = vmul.f32 %v2147_v11, %v791_v27  ;;  %v760_v32 = vpop.permute.xlu1 %759 }
 0x9a4   :  { %v762_v35 = vmul.f32 %v2149_v30, %v760_v32 }
 0x9a5   :  { %795 = vrot.lane.b32.xlu0 %v793_v31, %s2228_s30 }
 0x9a6   :  { %764 = vrot.lane.b32.xlu1 %v762_v35, %s2232_s27 }
 0xa17   :  { %v796_v38 = vpop.permute.xlu0 %795 }
 0xa18   :  { %v798_v42 = vadd.f32 %v796_v38, %v788_v37  ;;  %v765_v43 = vpop.permute.xlu1 %764 }
 0xa19   :  { %v767_v44 = vadd.f32 %v765_v43, %v757_v41 }
 0xa1a   :  { %2150 = vtanh.f32 %v798_v42  ;;  %v992_v16 = vrot.slane %v798_v42, 6 }
 0xa1b   :  { %2152 = vtanh.f32 %v767_v44 }
 0xa24   :  { %v2151_v45 = vpop.eup %2150 }
 0xa25   :  { %v2153_v46 = vpop.eup %2152  ;;  %801 = vrot.lane.b32.xlu0 %v2151_v45, %s2227_s0 }
 0xa26   :  { %770 = vrot.lane.b32.xlu1 %v2153_v46, %s2228_s30 }
 0xa97   :  { %v802_v47 = vpop.permute.xlu0 %801 }
 0xa98   :  { %v804_v48 = vmul.f32 %v2147_v11, %v802_v47  ;;  %v771_v49 = vpop.permute.xlu1 %770 }
 0xa99   :  { %v2440_v50 = vmul.f32 %v2149_v30, %v771_v49 }
 0xa9a   :  { %v806_v52 = vrot.slane %v804_v48, 6 }
 0xa9b   :  { %883 = vrot.lane.b32.xlu1 %v2440_v50, %s2233_s5 }
 0xa9c   :  { %807 = vrot.lane.b32.xlu0 %v806_v52, %s2228_s30 }
 0xb0d   :  { %v884_v53 = vpop.permute.xlu1 %883 }
 0xb0e   :  { %v808_v54 = vpop.permute.xlu0 %807  ;;  %1966 = vmatmul.mubr.msk.f32.vlgmr.msra.gmra.mrb[6].mxu1 %vm44_vm0, %v884_v53 }
 0xb0f   :  { %1886 = vmatmul.mubr.msk.f32.vlgmr.msra.gmra.mrb[8].mxu0 %vm179_vm4, %v808_v54  ;;  %2047 = vmatpush1.bf16.msra.mxu1 %v2323_v33 }
 0xb10   :  { %2049 = vmatprep.subr.bf16.mxu1 %v2325_v34  ;;  %1080 = vmatprep.mubr.f32.mxu1 %v2226_v5 }
 0xb11   :  { %2054 = vmatpush3.bf16.msra.mxu0 %v2343_v40  ;;  %1972 = vmatprep.mubr.msk.f32.mxu0 %vm2230_vm3, %v2226_v5 }
 0xb12   :  { %2056 = vmatprep.subr.bf16.mxu0 %v2312_v29 }
 0xb13   :  { %2051 = vmatpush1.bf16.msra.mxu1 %v2341_v39 }
 0xb14   :  { %2063 = vmatprep.subr.bf16.mxu1 %v2229_v28 }
 0xbe1   :  { %v953_v55 = vpop.f32.mrb[6].mxu1 }
 0xbe2   :  { %v877_v56 = vpop.f32.mrb[8].mxu0  ;;  %v1967_v57 = vpop.f32.mrb[7].mxu1 }
 0xbe3   :  { %v983_v58 = vadd.f32 %v877_v56, %v2291_v8  ;;  %v879_v59 = vpop.f32.mrb[9].mxu0 }
 0xbe4   :  { %v957_v60 = vadd.f32 %v953_v55, %v879_v59 }
 0xbe5   :  { %2154 = vtanh.f32 %v983_v58  ;;  %v1889_v0 = vmul.f32 -1.442695, %v983_v58 }
 0xbe6   :  { %v958_v61 = vadd.f32 %v2372_v51, %v957_v60 }
 0xbe8   :  { %2156 = vtanh.f32 %v958_v61  ;;  %v1888_v1 = vmul.f32 -1.442695, %v958_v61 }
 0xbe9   :  { %2158 = vpow2.f32 %v1889_v0 }
 0xbea   :  { %2160 = vpow2.f32 %v1888_v1 }
 0xbef   :  { %v2155_v62 = vpop.eup %2154 }
 0xbf0   :  { %996 = vrot.lane.b32.xlu0 %v2155_v62, %s2227_s0 }
 0xbf2   :  { %v2157_v63 = vpop.eup %2156 }
 0xbf3   :  { %968 = vrot.lane.b32.xlu1 %v2157_v63, %s2231_s26  ;;  %v2159_v2 = vpop.eup %2158 }
 0xbf4   :  { %v2161_v3 = vpop.eup %2160  ;;  %v987_v6 = vadd.f32 1.0, %v2159_v2 }
 0xbf5   :  { %v962_v7 = vadd.f32 1.0, %v2161_v3 }
 0xbf6   :  { %2162 = vrcp.f32 %v987_v6 }
 0xbf7   :  { %2164 = vrcp.f32 %v962_v7 }
 0xc00   :  { %v2163_v9 = vpop.eup %2162 }
 0xc01   :  { %v2165_v13 = vpop.eup %2164  ;;  %v994_v17 = vmul.f32 %v2163_v9, %v992_v16 }
 0xc02   :  { %v966_v20 = vmul.f32 %v2165_v13, %v767_v44 }
 0xc62   :  { %v997_v10 = vpop.permute.xlu0 %996 }
 0xc63   :  { %v999_v12 = vmul.f32 %v2163_v9, %v997_v10 }
 0xc65   :  { %1001 = vrot.lane.b32.xlu0 %v999_v12, %s2228_s30  ;;  %v969_v14 = vpop.permute.xlu1 %968 }
 0xc66   :  { %v971_v15 = vmul.f32 %v2165_v13, %v969_v14 }
 0xc68   :  { %973 = vrot.lane.b32.xlu1 %v971_v15, %s2232_s27 }
 0xcd7   :  { %v1002_v18 = vpop.permute.xlu0 %1001 }
 0xcd8   :  { %v1004_v19 = vadd.f32 %v1002_v18, %v994_v17 }
 0xcda   :  { %2166 = vtanh.f32 %v1004_v19  ;;  %v974_v21 = vpop.permute.xlu1 %973  ;;  %v1200_v61 = vrot.slane %v1004_v19, 6 }
 0xcdb   :  { %v976_v22 = vadd.f32 %v974_v21, %v966_v20 }
 0xcdd   :  { %2168 = vtanh.f32 %v976_v22 }
 0xce4   :  { %v2167_v23 = vpop.eup %2166 }
 0xce5   :  { %1007 = vrot.lane.b32.xlu0 %v2167_v23, %s2227_s0 }
 0xce7   :  { %v2169_v24 = vpop.eup %2168 }
 0xce8   :  { %979 = vrot.lane.b32.xlu1 %v2169_v24, %s2228_s30 }
 0xd57   :  { %v1008_v26 = vpop.permute.xlu0 %1007 }
 0xd58   :  { %v1010_v11 = vmul.f32 %v2163_v9, %v1008_v26 }
 0xd5a   :  { %1012 = vrot.lane.b32.xlu0 %v1010_v11, %s2228_s30  ;;  %v980_v27 = vpop.permute.xlu1 %979 }
 0xd5b   :  { %v2465_v30 = vmul.f32 %v2165_v13, %v980_v27 }
 0xd5d   :  { %1088 = vrot.lane.b32.xlu1 %v2465_v30, %s2233_s5 }
 0xdcc   :  { %v1013_v31 = vpop.permute.xlu0 %1012 }
 0xdcd   :  { %1890 = vmatmul.mubr.msk.f32.vlgmr.msra.gmra.mrb[8].mxu1 %vm179_vm4, %v1013_v31 }
 0xdce   :  { %2065 = vmatpush3.bf16.msra.mxu1 %v2343_v40  ;;  %1979 = vmatprep.mubr.msk.f32.mxu1 %vm2230_vm3, %v2226_v5 }
 0xdcf   :  { %v1089_v32 = vpop.permute.xlu1 %1088  ;;  %2067 = vmatprep.subr.bf16.mxu1 %v2312_v29 }
 0xdd0   :  { %1973 = vmatmul.mubr.msk.f32.vlgmr.msra.gmra.mrb[10].mxu0 %vm44_vm0, %v1089_v32 }
 0xdd1   :  { %2058 = vmatpush1.bf16.msra.mxu0 %v2323_v33  ;;  %1289 = vmatprep.mubr.f32.mxu0 %v2226_v5 }
 0xdd2   :  { %2060 = vmatprep.subr.bf16.mxu0 %v2325_v34 }
 0xdd5   :  { %2062 = vmatpush1.bf16.msra.mxu0 %v2341_v39 }
 0xdd6   :  { %2074 = vmatprep.subr.bf16.mxu0 %v2229_v28 }
 0xea0   :  { %v1082_v35 = vpop.f32.mrb[8].mxu1 }
 0xea1   :  { %v1189_v36 = vrot.slane %v1082_v35, 6  ;;  %v1084_v37 = vpop.f32.mrb[9].mxu1 }
 0xea3   :  { %v1191_v38 = vadd.f32 %v1189_v36, %v2291_v8  ;;  %v1158_v41 = vpop.f32.mrb[10].mxu0 }
 0xea4   :  { %v1162_v42 = vadd.f32 %v1158_v41, %v1084_v37  ;;  %v1974_v43 = vpop.f32.mrb[11].mxu0 }
 0xea5   :  { %2170 = vtanh.f32 %v1191_v38  ;;  %v1893_v47 = vmul.f32 -1.442695, %v1191_v38 }
 0xea6   :  { %v1163_v44 = vadd.f32 %v2372_v51, %v1162_v42 }
 0xea8   :  { %2172 = vtanh.f32 %v1163_v44  ;;  %v1892_v48 = vmul.f32 -1.442695, %v1163_v44 }
 0xea9   :  { %2174 = vpow2.f32 %v1893_v47 }
 0xeaa   :  { %2176 = vpow2.f32 %v1892_v48 }
 0xeaf   :  { %v2171_v45 = vpop.eup %2170 }
 0xeb0   :  { %1204 = vrot.lane.b32.xlu0 %v2171_v45, %s2227_s0 }
 0xeb2   :  { %v2173_v46 = vpop.eup %2172 }
 0xeb3   :  { %1173 = vrot.lane.b32.xlu1 %v2173_v46, %s2231_s26  ;;  %v2175_v49 = vpop.eup %2174 }
 0xeb4   :  { %v2177_v52 = vpop.eup %2176  ;;  %v1195_v53 = vadd.f32 1.0, %v2175_v49 }
 0xeb5   :  { %v1167_v54 = vadd.f32 1.0, %v2177_v52 }
 0xeb6   :  { %2178 = vrcp.f32 %v1195_v53 }
 0xeb7   :  { %2180 = vrcp.f32 %v1167_v54 }
 0xec0   :  { %v2179_v55 = vpop.eup %2178 }
 0xec1   :  { %v2181_v58 = vpop.eup %2180  ;;  %v1202_v62 = vmul.f32 %v2179_v55, %v1200_v61 }
 0xec2   :  { %v1171_v1 = vmul.f32 %v2181_v58, %v976_v22 }
 0xf22   :  { %v1205_v56 = vpop.permute.xlu0 %1204 }
 0xf23   :  { %v1207_v57 = vmul.f32 %v2179_v55, %v1205_v56 }
 0xf25   :  { %1209 = vrot.lane.b32.xlu0 %v1207_v57, %s2228_s30  ;;  %v1174_v59 = vpop.permute.xlu1 %1173 }
 0xf26   :  { %v1176_v60 = vmul.f32 %v2181_v58, %v1174_v59 }
 0xf28   :  { %1178 = vrot.lane.b32.xlu1 %v1176_v60, %s2232_s27 }
 0xf97   :  { %v1210_v63 = vpop.permute.xlu0 %1209 }
 0xf98   :  { %v2486_v0 = vadd.f32 %v1210_v63, %v1202_v62 }
 0xf9a   :  { %2182 = vtanh.f32 %v2486_v0  ;;  %v1179_v2 = vpop.permute.xlu1 %1178  ;;  %v1409_v44 = vrot.slane %v2486_v0, 6 }
 0xf9b   :  { %v1181_v3 = vadd.f32 %v1179_v2, %v1171_v1 }
 0xf9d   :  { %2184 = vtanh.f32 %v1181_v3 }
 0xfa4   :  { %v2183_v6 = vpop.eup %2182 }
 0xfa5   :  { %1215 = vrot.lane.b32.xlu0 %v2183_v6, %s2227_s0 }
 0xfa7   :  { %v2185_v7 = vpop.eup %2184 }
 0xfa8   :  { %1184 = vrot.lane.b32.xlu1 %v2185_v7, %s2228_s30 }
0x1017   :  { %v1216_v9 = vpop.permute.xlu0 %1215 }
0x1018   :  { %v1218_v10 = vmul.f32 %v2179_v55, %v1216_v9 }
0x101a   :  { %v1220_v12 = vrot.slane %v1218_v10, 2  ;;  %v1185_v13 = vpop.permute.xlu1 %1184 }
0x101b   :  { %v2491_v14 = vmul.f32 %v2181_v58, %v1185_v13 }
0x101c   :  { %1221 = vrot.lane.b32.xlu0 %v1220_v12, %s2228_s30 }
0x101d   :  { %1297 = vrot.lane.b32.xlu1 %v2491_v14, %s2233_s5 }
0x108e   :  { %v1222_v15 = vpop.permute.xlu0 %1221 }
0x108f   :  { %1894 = vmatmul.mubr.msk.f32.vlgmr.msra.gmra.mrb[12].mxu0 %vm179_vm4, %v1222_v15  ;;  %v1298_v16 = vpop.permute.xlu1 %1297 }
0x1090   :  { %1980 = vmatmul.mubr.msk.f32.vlgmr.msra.gmra.mrb[10].mxu1 %vm44_vm0, %v1298_v16  ;;  %2076 = vmatpush3.bf16.msra.mxu0 %v2343_v40 }
0x1091   :  { %2069 = vmatpush1.bf16.msra.mxu1 %v2323_v33  ;;  %1986 = vmatprep.mubr.msk.f32.mxu0 %vm2230_vm3, %v2226_v5 }
0x1092   :  { %2071 = vmatprep.subr.bf16.mxu1 %v2325_v34  ;;  %1498 = vmatprep.mubr.f32.mxu1 %v2226_v5 }
0x1093   :  { %2078 = vmatprep.subr.bf16.mxu0 %v2312_v29 }
0x1095   :  { %2073 = vmatpush1.bf16.msra.mxu1 %v2341_v39 }
0x1096   :  { %2085 = vmatprep.subr.bf16.mxu1 %v2229_v28 }
0x1162   :  { %v1291_v17 = vpop.f32.mrb[12].mxu0 }
0x1163   :  { %v1398_v18 = vrot.slane %v1291_v17, 4  ;;  %v1293_v19 = vpop.f32.mrb[13].mxu0  ;;  %v1367_v20 = vpop.f32.mrb[10].mxu1 }
0x1164   :  { %v1371_v21 = vadd.f32 %v1367_v20, %v1293_v19  ;;  %v1981_v22 = vpop.f32.mrb[11].mxu1 }
0x1165   :  { %v1400_v23 = vadd.f32 %v1398_v18, %v2291_v8 }
0x1166   :  { %v1372_v24 = vadd.f32 %v2372_v51, %v1371_v21 }
0x1167   :  { %2186 = vtanh.f32 %v1400_v23  ;;  %v1897_v29 = vmul.f32 -1.442695, %v1400_v23 }
0x1168   :  { %2188 = vtanh.f32 %v1372_v24  ;;  %v1896_v28 = vmul.f32 -1.442695, %v1372_v24 }
0x1169   :  { %2190 = vpow2.f32 %v1897_v29 }
0x116a   :  { %2192 = vpow2.f32 %v1896_v28 }
0x1171   :  { %v2187_v26 = vpop.eup %2186 }
0x1172   :  { %v2189_v11 = vpop.eup %2188  ;;  %1413 = vrot.lane.b32.xlu0 %v2187_v26, %s2227_s0 }
0x1173   :  { %1382 = vrot.lane.b32.xlu1 %v2189_v11, %s2231_s26  ;;  %v2191_v27 = vpop.eup %2190 }
0x1174   :  { %v2193_v31 = vpop.eup %2192  ;;  %v1404_v32 = vadd.f32 1.0, %v2191_v27 }
0x1175   :  { %v1376_v35 = vadd.f32 1.0, %v2193_v31 }
0x1176   :  { %2194 = vrcp.f32 %v1404_v32 }
0x1177   :  { %2196 = vrcp.f32 %v1376_v35 }
0x1180   :  { %v2195_v36 = vpop.eup %2194 }
0x1181   :  { %v2197_v38 = vpop.eup %2196  ;;  %v1411_v45 = vmul.f32 %v2195_v36, %v1409_v44 }
0x1182   :  { %v1380_v47 = vmul.f32 %v2197_v38, %v1181_v3 }
0x11e4   :  { %v1414_v37 = vpop.permute.xlu0 %1413 }
0x11e5   :  { %v1416_v41 = vmul.f32 %v2195_v36, %v1414_v37  ;;  %v1383_v42 = vpop.permute.xlu1 %1382 }
0x11e6   :  { %v1385_v43 = vmul.f32 %v2197_v38, %v1383_v42 }
0x11e7   :  { %1418 = vrot.lane.b32.xlu0 %v1416_v41, %s2228_s30 }
0x11e8   :  { %1387 = vrot.lane.b32.xlu1 %v1385_v43, %s2232_s27 }
0x1259   :  { %v1419_v46 = vpop.permute.xlu0 %1418 }
0x125a   :  { %v1421_v48 = vadd.f32 %v1419_v46, %v1411_v45  ;;  %v1388_v49 = vpop.permute.xlu1 %1387 }
0x125b   :  { %v1390_v52 = vadd.f32 %v1388_v49, %v1380_v47 }
0x125c   :  { %2198 = vtanh.f32 %v1421_v48  ;;  %v1618_v19 = vrot.slane %v1421_v48, 6 }
0x125d   :  { %2200 = vtanh.f32 %v1390_v52 }
0x1266   :  { %v2199_v53 = vpop.eup %2198 }
0x1267   :  { %v2201_v54 = vpop.eup %2200  ;;  %1424 = vrot.lane.b32.xlu0 %v2199_v53, %s2227_s0 }
0x1268   :  { %1393 = vrot.lane.b32.xlu1 %v2201_v54, %s2228_s30 }
0x12d9   :  { %v1425_v55 = vpop.permute.xlu0 %1424 }
0x12da   :  { %v1427_v56 = vmul.f32 %v2195_v36, %v1425_v55  ;;  %v1394_v57 = vpop.permute.xlu1 %1393 }
0x12db   :  { %v2516_v58 = vmul.f32 %v2197_v38, %v1394_v57 }
0x12dc   :  { %v1429_v59 = vrot.slane %v1427_v56, 4 }
0x12dd   :  { %1506 = vrot.lane.b32.xlu1 %v2516_v58, %s2233_s5 }
0x12de   :  { %1430 = vrot.lane.b32.xlu0 %v1429_v59, %s2228_s30 }
0x134f   :  { %v1507_v60 = vpop.permute.xlu1 %1506 }
0x1350   :  { %v1431_v61 = vpop.permute.xlu0 %1430  ;;  %1987 = vmatmul.mubr.msk.f32.vlgmr.msra.gmra.mrb[14].mxu0 %vm44_vm0, %v1507_v60 }
0x1351   :  { %1898 = vmatmul.mubr.msk.f32.vlgmr.msra.gmra.mrb[12].mxu1 %vm179_vm4, %v1431_v61  ;;  %2080 = vmatpush1.bf16.msra.mxu0 %v2323_v33 }
0x1352   :  { %2082 = vmatprep.subr.bf16.mxu0 %v2325_v34  ;;  %2087 = vmatpush3.bf16.msra.mxu1 %v2343_v40 }
0x1353   :  { %1993 = vmatprep.mubr.msk.f32.mxu1 %vm2230_vm3, %v2226_v5  ;;  %1707 = vmatprep.mubr.f32.mxu0 %v2226_v5 }
0x1355   :  { %2084 = vmatpush1.bf16.msra.mxu0 %v2341_v39 }
0x1423   :  { %v1576_v62 = vpop.f32.mrb[14].mxu0 }
0x1424   :  { %v1500_v63 = vpop.f32.mrb[12].mxu1  ;;  %v1988_v0 = vpop.f32.mrb[15].mxu0 }
0x1425   :  { %v1607_v1 = vrot.slane %v1500_v63, 2  ;;  %v1502_v2 = vpop.f32.mrb[13].mxu1 }
0x1426   :  { %v1580_v3 = vadd.f32 %v1576_v62, %v1502_v2 }
0x1427   :  { %v1609_v6 = vadd.f32 %v1607_v1, %v2291_v8 }
0x1428   :  { %v1581_v33 = vadd.f32 %v2372_v51, %v1580_v3 }
0x1429   :  { %2202 = vtanh.f32 %v1609_v6  ;;  %v1901_v5 = vmul.f32 -1.442695, %v1609_v6 }
0x142a   :  { %2204 = vtanh.f32 %v1581_v33  ;;  %v1900_v39 = vmul.f32 -1.442695, %v1581_v33 }
0x142b   :  { %2206 = vpow2.f32 %v1901_v5 }
0x142c   :  { %2208 = vpow2.f32 %v1900_v39 }
0x1433   :  { %v2203_v34 = vpop.eup %2202 }
0x1434   :  { %v2205_v40 = vpop.eup %2204  ;;  %1622 = vrot.lane.b32.xlu0 %v2203_v34, %s2227_s0 }
0x1435   :  { %1591 = vrot.lane.b32.xlu1 %v2205_v40, %s2231_s26  ;;  %v2207_v7 = vpop.eup %2206 }
0x1436   :  { %v2209_v9 = vpop.eup %2208  ;;  %v1613_v10 = vadd.f32 1.0, %v2207_v7 }
0x1437   :  { %v1585_v12 = vadd.f32 1.0, %v2209_v9 }
0x1438   :  { %2210 = vrcp.f32 %v1613_v10 }
0x1439   :  { %2212 = vrcp.f32 %v1585_v12 }
0x1442   :  { %v2211_v8 = vpop.eup %2210 }
0x1443   :  { %v2213_v15 = vpop.eup %2212  ;;  %v1620_v20 = vmul.f32 %v2211_v8, %v1618_v19 }
0x1444   :  { %v1589_v22 = vmul.f32 %v2213_v15, %v1390_v52 }
0x14a6   :  { %v1623_v13 = vpop.permute.xlu0 %1622 }
0x14a7   :  { %v1625_v16 = vmul.f32 %v2211_v8, %v1623_v13  ;;  %v1592_v17 = vpop.permute.xlu1 %1591 }
0x14a8   :  { %v1594_v18 = vmul.f32 %v2213_v15, %v1592_v17 }
0x14a9   :  { %1627 = vrot.lane.b32.xlu0 %v1625_v16, %s2228_s30 }
0x14aa   :  { %1596 = vrot.lane.b32.xlu1 %v1594_v18, %s2232_s27 }
0x151b   :  { %v1628_v21 = vpop.permute.xlu0 %1627 }
0x151c   :  { %v1630_v23 = vadd.f32 %v1628_v21, %v1620_v20  ;;  %v1597_v24 = vpop.permute.xlu1 %1596 }
0x151d   :  { %v1599_v26 = vadd.f32 %v1597_v24, %v1589_v22 }
0x151e   :  { %2214 = vtanh.f32 %v1630_v23 }
0x151f   :  { %2216 = vtanh.f32 %v1599_v26 }
0x1528   :  { %v2215_v11 = vpop.eup %2214 }
0x1529   :  { %v2217_v29 = vpop.eup %2216  ;;  %1633 = vrot.lane.b32.xlu0 %v2215_v11, %s2227_s0 }
0x152a   :  { %1602 = vrot.lane.b32.xlu1 %v2217_v29, %s2228_s30 }
0x159b   :  { %v1634_v28 = vpop.permute.xlu0 %1633 }
0x159c   :  { %v1636_v27 = vmul.f32 %v2211_v8, %v1634_v28  ;;  %v1603_v31 = vpop.permute.xlu1 %1602 }
0x159d   :  { %v1605_v32 = vmul.f32 %v2213_v15, %v1603_v31 }
0x159e   :  { %v1638_v35 = vrot.slane %v1636_v27, 6 }
0x159f   :  { %1715 = vrot.lane.b32.xlu1 %v1605_v32, %s2233_s5 }
0x15a0   :  { %1639 = vrot.lane.b32.xlu0 %v1638_v35, %s2228_s30 }
0x1611   :  { %v1716_v36 = vpop.permute.xlu1 %1715 }
0x1612   :  { %v1640_v37 = vpop.permute.xlu0 %1639  ;;  %1994 = vmatmul.mubr.msk.f32.vlgmr.msra.gmra.mrb[14].mxu1 %vm44_vm0, %v1716_v36 }
0x1613   :  { %1902 = vmatmul.mubr.msk.f32.vlgmr.msra.gmra.mrb[16].mxu0 %vm179_vm4, %v1640_v37 }
0x16e5   :  { %v1785_v38 = vpop.f32.mrb[14].mxu1 }
0x16e6   :  { %v1709_v41 = vpop.f32.mrb[16].mxu0  ;;  %v1995_v42 = vpop.f32.mrb[15].mxu1 }
0x16e7   :  { %1848 = vst [vmem:[#allocation2] sm:$0x3] %v1709_v41  ;;  %v1711_v43 = vpop.f32.mrb[17].mxu0 }
0x16e8   :  { %v1789_v44 = vadd.f32 %v1785_v38, %v1711_v43 }
0x16ea   :  { %v1790_v45 = vadd.f32 %v2372_v51, %v1789_v44 }
0x16ec   :  { %2218 = vtanh.f32 %v1790_v45  ;;  %v1904_v47 = vmul.f32 -1.442695, %v1790_v45 }
0x16ee   :  { %2220 = vpow2.f32 %v1904_v47 }
0x16f6   :  { %v2219_v46 = vpop.eup %2218 }
0x16f7   :  { %1800 = vrot.lane.b32.xlu0 %v2219_v46, %s2231_s26 }
0x16f8   :  { %v2221_v48 = vpop.eup %2220 }
0x16f9   :  { %v1794_v49 = vadd.f32 1.0, %v2221_v48 }
0x16fb   :  { %2222 = vrcp.f32 %v1794_v49 }
0x1705   :  { %v2223_v52 = vpop.eup %2222 }
0x1706   :  { %v1798_v51 = vmul.f32 %v2223_v52, %v1599_v26 }
0x1769   :  { %v1801_v53 = vpop.permute.xlu0 %1800 }
0x176a   :  { %v1803_v54 = vmul.f32 %v2223_v52, %v1801_v53 }
0x176c   :  { %1805 = vrot.lane.b32.xlu1 %v1803_v54, %s2232_s27 }
0x1770   :  { %1816 = vrot.lane.b32.xlu1 %v2415_v4, %s2231_s26 }
0x1774   :  { %1822 = vrot.lane.b32.xlu1 %v2491_v14, %s2232_s27 }
0x1778   :  { %1828 = vrot.lane.b32.xlu1 %v1605_v32, %s2234_s28 }
0x177c   :  { %1850 = vrot.lane.b32.xlu1 %v1630_v23, %s2231_s26 }
0x17de   :  { %v1806_v55 = vpop.permute.xlu1 %1805 }
0x17df   :  { %v1808_v56 = vadd.f32 %v1806_v55, %v1798_v51 }
0x17e1   :  { %2224 = vtanh.f32 %v1808_v56  ;;  %1861 = vrot.lane.b32.xlu1 %v1808_v56, %s2235_s1 }
0x17e2   :  { %v1817_v57 = vpop.permute.xlu1 %1816 }
0x17e3   :  { %v1835_v1 = vsel %vm44_vm0, %v2390_v25, %v1817_v57 }
0x17e6   :  { %v1823_v59 = vpop.permute.xlu1 %1822 }
0x17ea   :  { %v1829_v60 = vpop.permute.xlu1 %1828 }
0x17eb   :  { %v2225_v61 = vpop.eup %2224 }
0x17ec   :  { %1811 = vrot.lane.b32.xlu0 %v2225_v61, %s2228_s30 }
0x17ee   :  { %v1851_v4 = vpop.permute.xlu1 %1850 }
0x17ef   :  { %1854 = vst.msk [vmem:[#allocation3 - $0x6] sm:$0xc0] %vm1853_vm5, %v1851_v4 }
0x17f0   :  { %1819 = vrot.lane.b32.xlu0 %v2440_v50, %s2235_s1 }
0x17f4   :  { %1825 = vrot.lane.b32.xlu0 %v2516_v58, %s2228_s30 }
0x1853   :  { %v1862_v14 = vpop.permute.xlu1 %1861 }
0x1854   :  { %1864 = vst.msk [vmem:[#allocation5] sm:$0x3] %vm30_vm2, %v1862_v14 }
0x185e   :  { %v1812_v62 = vpop.permute.xlu0 %1811 }
0x185f   :  { %v1814_v63 = vmul.f32 %v2223_v52, %v1812_v62 }
0x1861   :  { %1832 = vrot.lane.b32.xlu0 %v1814_v63, %s2227_s0 }
0x1862   :  { %v1820_v0 = vpop.permute.xlu0 %1819 }
0x1863   :  { %v1836_v2 = vsel %vm179_vm4, %v1835_v1, %v1820_v0 }
0x1864   :  { %v1838_v50 = vsel %vm1837_vm6, %v1836_v2, %v2465_v30 }
0x1865   :  { %1855 = vrot.lane.b32.xlu0 %v1814_v63, %s2233_s5  ;;  %v1840_v58 = vsel %vm1839_vm7, %v1838_v50, %v1823_v59 }
0x1866   :  { %v1826_v3 = vpop.permute.xlu0 %1825 }
0x1867   :  { %v1842_v6 = vsel %vm1841_vm8, %v1840_v58, %v1826_v3 }
0x1868   :  { %v1844_v33 = vsel %vm1843_vm9, %v1842_v6, %v1829_v60 }
0x18d3   :  { %v1833_v34 = vpop.permute.xlu0 %1832 }
0x18d4   :  { %v1846_v40 = vsel %vm1845_vm10, %v1844_v33, %v1833_v34 }
0x18d5   :  { %1847 = vst [vmem:[%s2571_s6] sm:$0x3] %v1846_v40 }
0x18d7   :  { %v1856_v25 = vpop.permute.xlu0 %1855 }
0x18d8   :  { %1859 = vst.msk [vmem:[#allocation4] sm:$0x3] %vm30_vm2, %v1856_v25 }

</bundles_post_ra>
